<compile_context>
chip_gen: v7x
topology: tpu7x:2x2x1
jax: 0.10.0
libtpu: 0.0.40
codegen_flags: <defaults>
</compile_context>

<pallas_src>
import functools

import jax
import jax.numpy as jnp
import numpy as np
from jax import lax
from jax.experimental import pallas as pl
from jax.experimental.pallas import tpu as pltpu

LANE = 128


# ---------------------------------------------------------------------------
# small helpers
# ---------------------------------------------------------------------------

def _round_up(x, m):
    return (x + m - 1) // m * m


def _embed(a, shape, dtype):
    """Place `a` in the top-left corner of zeros(shape)."""
    out = jnp.zeros(shape, dtype)
    return out.at[tuple(slice(0, s) for s in a.shape)].set(a.astype(dtype))


def _pick_row_tile(H_out, W, Cpi, Cph, Cpo, stride, itemsize,
                   budget_bytes=12 * 1024 * 1024):
    """Largest divisor of H_out whose per-step working set fits a conservative VMEM
    budget (headroom for v7x's 64 MiB physical VMEM with double-buffered blocks)."""
    Wk = (W + 2) if stride == 1 else (W // stride)
    Wo = W // stride
    weights = (Cpi * Cph + Cph * Cpo + 10 * Cph + Cpo) * 4
    best = 1
    for th in range(1, H_out + 1):
        if H_out % th:
            continue
        n_act = 1 if stride == 1 else 6
        in_b = th * Wk * Cpi * itemsize * n_act + 3 * Wk * Cpi * itemsize
        out_b = th * Wo * Cpo * itemsize
        hid_b = (th * stride + 2) * Wk * Cph * 4 * 3   # hidden + acc + temporaries
        total = 2 * (in_b + out_b) + hid_b + weights
        if total <= budget_bytes:
            best = th
    return best


# ---------------------------------------------------------------------------
# fused kernels
# ---------------------------------------------------------------------------

def _make_kernel_s1(*, TH, W, Wp2, Cpi, Cph, Cpo, has_expand, use_res):
    """Fused expand -> depthwise(3x3, stride 1) -> project (+residual) for one
    (batch, row-tile) grid step.  Input x is W-padded by 1 on each side and
    channel-padded; the halo ROWS arrive as extra 1-row blocks."""

    def kernel(xm_ref, xt_ref, xb_ref, *rest):
        if has_expand:
            w1_ref, b1_ref, wd_ref, b2_ref, w3_ref, b3_ref, o_ref = rest
        else:
            wd_ref, b2_ref, w3_ref, b3_ref, o_ref = rest

        r = pl.program_id(1)
        last = pl.num_programs(1) - 1

        # Interior-column mask: the W-halo columns must map to ZERO *hidden*
        # activations (the depthwise zero-padding applies to the hidden tensor,
        # not to relu(bias_of_expand)).
        col = lax.broadcasted_iota(jnp.int32, (Wp2, Cph), 0)
        wmask = ((col >= 1) & (col <= W)).astype(jnp.float32)

        xm = xm_ref[0]                                         # (TH, Wp2, Cpi)

        if has_expand:
            w1 = w1_ref[...]
            b1 = b1_ref[...]

            def expand(x2d):                                   # (M, Cpi) -> (M, Cph) f32
                y = jnp.dot(x2d, w1, preferred_element_type=jnp.float32)
                return jnp.maximum(y + b1, 0.0)

            hid_main = expand(xm.reshape(TH * Wp2, Cpi)).reshape(TH, Wp2, Cph)
            hid_top = expand(xt_ref[0, 0])
            hid_bot = expand(xb_ref[0, 0])
        else:
            hid_main = xm.astype(jnp.float32)
            hid_top = xt_ref[0, 0].astype(jnp.float32)
            hid_bot = xb_ref[0, 0].astype(jnp.float32)

        hid_main = hid_main * wmask
        hid_top = jnp.where(r > 0, hid_top * wmask, 0.0)       # image top border -> 0
        hid_bot = jnp.where(r < last, hid_bot * wmask, 0.0)    # image bottom border -> 0

        # (TH+2, W+2, Cph) spatially padded hidden (leading-dim concat only)
        hfull = jnp.concatenate([hid_top[None], hid_main, hid_bot[None]], axis=0)

        wd = wd_ref[...]                                       # (9, Cph), BN scale folded
        acc = jnp.zeros((TH, W, Cph), jnp.float32)
        for kx in range(3):
            colv = hfull[:, kx:kx + W, :]                      # (TH+2, W, Cph)
            for ky in range(3):
                acc = acc + colv[ky:ky + TH] * wd[3 * ky + kx]
        h2 = jnp.maximum(acc + b2_ref[...], 0.0)               # (TH, W, Cph)

        y = jnp.dot(h2.reshape(TH * W, Cph).astype(w3_ref.dtype), w3_ref[...],
                    preferred_element_type=jnp.float32)
        y = jnp.maximum(y + b3_ref[...], 0.0)
        if use_res:
            y = y + xm[:, 1:W + 1, :].reshape(TH * W, Cpi).astype(jnp.float32)
        o_ref[0] = y.reshape(TH, W, Cpo).astype(o_ref.dtype)

    return kernel


def _make_kernel_s2(*, TH, Wo, Cpi, Cph, Cpo, has_expand):
    """Fused expand -> depthwise(3x3, stride 2) -> project for one (batch, row-tile)
    grid step.  The wrapper supplies parity-split input views so the kernel computes
    ONLY the stride-2 output positions (no 4x over-compute, no strided slices)."""

    def kernel(xee_ref, xeo_ref, xoe_ref, xoo_ref, xeol_ref, xool_ref,
               xoet_ref, xoot_ref, xoolt_ref, *rest):
        if has_expand:
            w1_ref, b1_ref, wd_ref, b2_ref, w3_ref, b3_ref, o_ref = rest
        else:
            wd_ref, b2_ref, w3_ref, b3_ref, o_ref = rest

        r = pl.program_id(1)

        if has_expand:
            w1 = w1_ref[...]
            b1 = b1_ref[...]

            def expand(x2d):
                y = jnp.dot(x2d, w1, preferred_element_type=jnp.float32)
                return jnp.maximum(y + b1, 0.0)

            def hid_main(ref):                                 # (1,TH,Wo,Cpi) -> (TH,Wo,Cph)
                return expand(ref[0].reshape(TH * Wo, Cpi)).reshape(TH, Wo, Cph)

            def hid_row(ref):                                  # (1,1,Wo,Cpi) -> (Wo,Cph)
                return expand(ref[0, 0])
        else:
            def hid_main(ref):
                return ref[0].astype(jnp.float32)

            def hid_row(ref):
                return ref[0, 0].astype(jnp.float32)

        # Left-shifted ("_l") grids carry the image's left zero-padding at col 0:
        # their *hidden* value there must be zero.
        col = lax.broadcasted_iota(jnp.int32, (Wo, Cph), 0)
        lmask = (col >= 1).astype(jnp.float32)

        EE = hid_main(xee_ref)                                 # hidden(2i,   2j  )
        EO = hid_main(xeo_ref)                                 # hidden(2i,   2j+1)
        OE = hid_main(xoe_ref)                                 # hidden(2i+1, 2j  )
        OO = hid_main(xoo_ref)                                 # hidden(2i+1, 2j+1)
        EOl = hid_main(xeol_ref) * lmask                       # hidden(2i,   2j-1)
        OOl = hid_main(xool_ref) * lmask                       # hidden(2i+1, 2j-1)

        top_ok = r > 0                                         # image top border -> 0
        OEt = jnp.where(top_ok, hid_row(xoet_ref), 0.0)
        OOt = jnp.where(top_ok, hid_row(xoot_ref), 0.0)
        OOlt = jnp.where(top_ok, hid_row(xoolt_ref) * lmask, 0.0)

        if TH > 1:                                             # row-shifted (i-1) views
            OE_s = jnp.concatenate([OEt[None], OE[:TH - 1]], axis=0)
            OO_s = jnp.concatenate([OOt[None], OO[:TH - 1]], axis=0)
            OOl_s = jnp.concatenate([OOlt[None], OOl[:TH - 1]], axis=0)
        else:
            OE_s, OO_s, OOl_s = OEt[None], OOt[None], OOlt[None]

        wd = wd_ref[...]                                       # (9, Cph), BN scale folded
        acc = (OOl_s * wd[0] + OE_s * wd[1] + OO_s * wd[2]
               + EOl * wd[3] + EE * wd[4] + EO * wd[5]
               + OOl * wd[6] + OE * wd[7] + OO * wd[8])
        h2 = jnp.maximum(acc + b2_ref[...], 0.0)               # (TH, Wo, Cph)

        y = jnp.dot(h2.reshape(TH * Wo, Cph).astype(w3_ref.dtype), w3_ref[...],
                    preferred_element_type=jnp.float32)
        y = jnp.maximum(y + b3_ref[...], 0.0)
        o_ref[0] = y.reshape(TH, Wo, Cpo).astype(o_ref.dtype)

    return kernel


# ---------------------------------------------------------------------------
# invertedBlock forward (fused Pallas)
# ---------------------------------------------------------------------------

def inverted_block_forward(x_nchw, params, *, ch_in, ch_out, expand_ratio, stride,
                           row_tile=None, compute_dtype=jnp.float32):
    assert stride in (1, 2)
    has_expand = expand_ratio != 1
    hidden = ch_in * expand_ratio
    use_res = (stride == 1) and (ch_in == ch_out)

    x = jnp.transpose(x_nchw, (0, 2, 3, 1)).astype(compute_dtype)   # NCHW -> NHWC
    N, H, W, _ = x.shape
    if stride == 2:
        assert H % 2 == 0 and W % 2 == 0, "stride=2 path assumes even H, W"
    H_out, W_out = H // stride, W // stride

    # lane-dense (multiple-of-128) channel padding
    Cpi = _round_up(ch_in, LANE)
    Cph = _round_up(hidden, LANE)
    Cpo = _round_up(ch_out, LANE)
    itemsize = jnp.dtype(compute_dtype).itemsize

    # ---- fold BN (inference running stats) scale into conv weights; pad channels ----
    wdp = _embed(params["w_dw"].reshape(9, hidden) * params["bn2_scale"],
                 (9, Cph), jnp.float32)
    b2p = _embed(params["bn2_bias"], (1, Cph), jnp.float32)
    w3p = _embed(params["w3"] * params["bn3_scale"], (Cph, Cpo), compute_dtype)
    b3p = _embed(params["bn3_bias"], (1, Cpo), jnp.float32)
    wparams, wspecs = [], []
    if has_expand:
        w1p = _embed(params["w1"] * params["bn1_scale"], (Cpi, Cph), compute_dtype)
        b1p = _embed(params["bn1_bias"], (1, Cph), jnp.float32)
        wparams += [w1p, b1p]
        wspecs += [pl.BlockSpec((Cpi, Cph), lambda n, r: (0, 0)),
                   pl.BlockSpec((1, Cph), lambda n, r: (0, 0))]
    wparams += [wdp, b2p, w3p, b3p]
    wspecs += [pl.BlockSpec((9, Cph), lambda n, r: (0, 0)),
               pl.BlockSpec((1, Cph), lambda n, r: (0, 0)),
               pl.BlockSpec((Cph, Cpo), lambda n, r: (0, 0)),
               pl.BlockSpec((1, Cpo), lambda n, r: (0, 0))]

    # ---- row tiling (VMEM-budgeted; both grid axes parallel for megacore) ----
    TH = row_tile if row_tile is not None else _pick_row_tile(
        H_out, W, Cpi, Cph, Cpo, stride, itemsize)
    TH = min(TH, H_out)
    assert H_out % TH == 0, "row_tile must divide the output height"
    R = H_out // TH
    grid = (N, R)

    cparams = pltpu.CompilerParams(
        dimension_semantics=("parallel", "parallel"),
        vmem_limit_bytes=32 * 1024 * 1024)

    flops = 18 * N * H_out * W_out * Cph + 2 * N * H_out * W_out * Cph * Cpo
    if has_expand:
        flops += 2 * N * H * W * Cpi * Cph
    bytes_accessed = ((N * H * W * Cpi + N * H_out * W_out * Cpo) * itemsize
                      + (Cpi * Cph + Cph * Cpo) * itemsize + 12 * Cph * 4)
    cost = pl.CostEstimate(flops=int(flops), transcendentals=0,
                           bytes_accessed=int(bytes_accessed))

    if stride == 1:
        Wp2 = W + 2
        # single pad op on the (smallest) input tensor: 1-px W halo + channel pad
        xp = jnp.pad(x, ((0, 0), (0, 0), (1, 1), (0, Cpi - ch_in)))
        kernel = _make_kernel_s1(TH=TH, W=W, Wp2=Wp2, Cpi=Cpi, Cph=Cph, Cpo=Cpo,
                                 has_expand=has_expand, use_res=use_res)
        act_specs = [
            pl.BlockSpec((1, TH, Wp2, Cpi), lambda n, r: (n, r, 0, 0)),
            pl.BlockSpec((1, 1, Wp2, Cpi),
                         lambda n, r: (n, jnp.maximum(r * TH - 1, 0), 0, 0)),
            pl.BlockSpec((1, 1, Wp2, Cpi),
                         lambda n, r: (n, jnp.minimum((r + 1) * TH, H - 1), 0, 0)),
        ]
        acts = [xp, xp, xp]
        out_spec = pl.BlockSpec((1, TH, W, Cpo), lambda n, r: (n, r, 0, 0))
        out_shape = jax.ShapeDtypeStruct((N, H, W, Cpo), compute_dtype)
    else:
        Wo = W_out
        xp = jnp.pad(x, ((0, 0), (0, 0), (0, 0), (0, Cpi - ch_in)))
        # parity-split views (cheap XLA slices of the small input tensor)
        xe, xo = xp[:, 0::2], xp[:, 1::2]
        x_ee, x_eo = xe[:, :, 0::2], xe[:, :, 1::2]
        x_oe, x_oo = xo[:, :, 0::2], xo[:, :, 1::2]
        zc = jnp.zeros_like(x_eo[:, :, :1])
        x_eo_l = jnp.concatenate([zc, x_eo[:, :, :Wo - 1]], axis=2)
        x_oo_l = jnp.concatenate([zc, x_oo[:, :, :Wo - 1]], axis=2)
        kernel = _make_kernel_s2(TH=TH, Wo=Wo, Cpi=Cpi, Cph=Cph, Cpo=Cpo,
                                 has_expand=has_expand)
        main_spec = pl.BlockSpec((1, TH, Wo, Cpi), lambda n, r: (n, r, 0, 0))
        halo_spec = pl.BlockSpec((1, 1, Wo, Cpi),
                                 lambda n, r: (n, jnp.maximum(r * TH - 1, 0), 0, 0))
        act_specs = [main_spec] * 6 + [halo_spec] * 3
        acts = [x_ee, x_eo, x_oe, x_oo, x_eo_l, x_oo_l, x_oe, x_oo, x_oo_l]
        out_spec = pl.BlockSpec((1, TH, Wo, Cpo), lambda n, r: (n, r, 0, 0))
        out_shape = jax.ShapeDtypeStruct((N, H_out, Wo, Cpo), compute_dtype)

    out = pl.pallas_call(
        kernel,
        out_shape=out_shape,
        grid=grid,
        in_specs=act_specs + wspecs,
        out_specs=out_spec,
        compiler_params=cparams,
        cost_estimate=cost,
    )(*acts, *wparams)

    # slice padded channels (fuses with the layout transpose in XLA)
    y = out[..., :ch_out].astype(x_nchw.dtype)
    return jnp.transpose(y, (0, 3, 1, 2))                      # NHWC -> NCHW


# ---------------------------------------------------------------------------
# deterministic params (folded inference BN) and pure-JAX reference
# ---------------------------------------------------------------------------

def _folded_bn(key, c, eps=1e-5):
    k1, k2, k3, k4 = jax.random.split(key, 4)
    gamma = jax.random.uniform(k1, (c,), jnp.float32, 0.5, 1.5)
    beta = 0.1 * jax.random.normal(k2, (c,), jnp.float32)
    mean = 0.1 * jax.random.normal(k3, (c,), jnp.float32)
    var = jax.random.uniform(k4, (c,), jnp.float32, 0.5, 1.5)
    scale = gamma / jnp.sqrt(var + eps)
    bias = beta - mean * scale
    return scale.reshape(1, c), bias.reshape(1, c)


def init_params(key, ch_in, ch_out, expand_ratio):
    hidden = ch_in * expand_ratio
    k1, k2, k3, k4, k5, k6 = jax.random.split(key, 6)
    params = {}
    if expand_ratio != 1:
        params["w1"] = 0.1 * jax.random.normal(k1, (ch_in, hidden), jnp.float32)
        params["bn1_scale"], params["bn1_bias"] = _folded_bn(k2, hidden)
    params["w_dw"] = 0.1 * jax.random.normal(k3, (3, 3, hidden), jnp.float32)
    params["bn2_scale"], params["bn2_bias"] = _folded_bn(k4, hidden)
    params["w3"] = 0.1 * jax.random.normal(k5, (hidden, ch_out), jnp.float32)
    params["bn3_scale"], params["bn3_bias"] = _folded_bn(k6, ch_out)
    return params


def inverted_block_reference(x_nchw, params, *, ch_in, ch_out, expand_ratio, stride):
    dn = ("NHWC", "HWIO", "NHWC")
    use_res = (stride == 1) and (ch_in == ch_out)
    x = jnp.transpose(x_nchw, (0, 2, 3, 1))
    h = x
    if expand_ratio != 1:
        w1 = params["w1"][None, None]
        h = jax.lax.conv_general_dilated(h, w1, (1, 1), "VALID", dimension_numbers=dn)
        h = jnp.maximum(h * params["bn1_scale"] + params["bn1_bias"], 0.0)
    C = h.shape[-1]
    wdw = params["w_dw"].reshape(3, 3, 1, C)
    h = jax.lax.conv_general_dilated(h, wdw, (stride, stride), ((1, 1), (1, 1)),
                                     dimension_numbers=dn, feature_group_count=C)
    h = jnp.maximum(h * params["bn2_scale"] + params["bn2_bias"], 0.0)
    w3 = params["w3"][None, None]
    h = jax.lax.conv_general_dilated(h, w3, (1, 1), "VALID", dimension_numbers=dn)
    h = jnp.maximum(h * params["bn3_scale"] + params["bn3_bias"], 0.0)
    if use_res:
        h = x + h
    return jnp.transpose(h, (0, 3, 1, 2))


# ---------------------------------------------------------------------------

if __name__ == "__main__":
    N, H, W = 2, 16, 16
    key = jax.random.PRNGKey(0)

    # (ch_in, ch_out, expand_ratio, stride, row_tile):
    #   residual path / stride-2 path / no-expand(+residual) path
    configs = [
        (8, 8, 4, 1, 8),
        (8, 16, 4, 2, 4),
        (8, 8, 1, 1, 8),
    ]

    for ch_in, ch_out, expand, stride, row_tile in configs:
        kx, kp, key = jax.random.split(key, 3)
        x = jax.random.normal(kx, (N, ch_in, H, W), jnp.float32)   # NCHW (PyTorch layout)
        params = init_params(kp, ch_in, ch_out, expand)

        fwd = jax.jit(functools.partial(
            inverted_block_forward, ch_in=ch_in, ch_out=ch_out,
            expand_ratio=expand, stride=stride, row_tile=row_tile))
        out = jax.block_until_ready(fwd(x, params))

        ref = jax.block_until_ready(inverted_block_reference(
            x, params, ch_in=ch_in, ch_out=ch_out, expand_ratio=expand, stride=stride))
        np.testing.assert_allclose(np.asarray(out), np.asarray(ref),
                                   rtol=1e-4, atol=1e-4)

    print("KERNEL_OK")
</pallas_src>

<mosaic_0001>
module attributes {stable_mosaic.version = 11 : i64} {
  func.func @kernel(%arg0: i32, %arg1: i32, %arg2: memref<1x8x18x128xf32, #tpu.memory_space<vmem>>, %arg3: memref<1x1x18x128xf32, #tpu.memory_space<vmem>>, %arg4: memref<1x1x18x128xf32, #tpu.memory_space<vmem>>, %arg5: memref<128x128xf32, #tpu.memory_space<vmem>>, %arg6: memref<1x128xf32, #tpu.memory_space<vmem>>, %arg7: memref<9x128xf32, #tpu.memory_space<vmem>>, %arg8: memref<1x128xf32, #tpu.memory_space<vmem>>, %arg9: memref<128x128xf32, #tpu.memory_space<vmem>>, %arg10: memref<1x128xf32, #tpu.memory_space<vmem>>, %arg11: memref<1x8x16x128xf32, #tpu.memory_space<vmem>>) attributes {dimension_semantics = [#tpu.dimension_semantics<parallel>, #tpu.dimension_semantics<parallel>], iteration_bounds = array<i64: 2, 2>, scalar_prefetch = 0 : i64, scratch_operands = 0 : i64, tpu.core_type = #tpu.core_type<tc>, window_params = [{transform_indices = @transform_0, window_bounds = array<i64: 1, 8, 18, 128>}, {transform_indices = @transform_1, window_bounds = array<i64: 1, 1, 18, 128>}, {transform_indices = @transform_2, window_bounds = array<i64: 1, 1, 18, 128>}, {pipeline_mode = #tpu.pipeline_mode<synchronous>, transform_indices = @transform_3, window_bounds = array<i64: 128, 128>}, {pipeline_mode = #tpu.pipeline_mode<synchronous>, transform_indices = @transform_4, window_bounds = array<i64: 1, 128>}, {pipeline_mode = #tpu.pipeline_mode<synchronous>, transform_indices = @transform_5, window_bounds = array<i64: 9, 128>}, {pipeline_mode = #tpu.pipeline_mode<synchronous>, transform_indices = @transform_6, window_bounds = array<i64: 1, 128>}, {pipeline_mode = #tpu.pipeline_mode<synchronous>, transform_indices = @transform_7, window_bounds = array<i64: 128, 128>}, {pipeline_mode = #tpu.pipeline_mode<synchronous>, transform_indices = @transform_8, window_bounds = array<i64: 1, 128>}, {transform_indices = @transform_9, window_bounds = array<i64: 1, 8, 16, 128>}]} {
    %0 = tpu.iota {dimensions = array<i32: 0>} : vector<18x128xi32>
    %c1_i32 = arith.constant 1 : i32
    %1 = vector.broadcast %c1_i32 : i32 to vector<18x128xi32>
    %2 = arith.cmpi sge, %0, %1 : vector<18x128xi32>
    %c16_i32 = arith.constant 16 : i32
    %3 = vector.broadcast %c16_i32 : i32 to vector<18x128xi32>
    %4 = arith.cmpi sle, %0, %3 : vector<18x128xi32>
    %5 = arith.andi %2, %4 : vector<18x128xi1>
    %6 = arith.extui %5 : vector<18x128xi1> to vector<18x128xi32>
    %7 = arith.sitofp %6 : vector<18x128xi32> to vector<18x128xf32>
    %c0 = arith.constant 0 : index
    %c0_0 = arith.constant 0 : index
    %c0_1 = arith.constant 0 : index
    %c0_2 = arith.constant 0 : index
    %8 = vector.load %arg2[%c0, %c0_0, %c0_1, %c0_2] : memref<1x8x18x128xf32, #tpu.memory_space<vmem>>, vector<1x8x18x128xf32>
    %9 = vector.shape_cast %8 : vector<1x8x18x128xf32> to vector<8x18x128xf32>
    %c0_3 = arith.constant 0 : index
    %c0_4 = arith.constant 0 : index
    %10 = vector.load %arg5[%c0_3, %c0_4] : memref<128x128xf32, #tpu.memory_space<vmem>>, vector<128x128xf32>
    %c0_5 = arith.constant 0 : index
    %c0_6 = arith.constant 0 : index
    %11 = vector.load %arg6[%c0_5, %c0_6] : memref<1x128xf32, #tpu.memory_space<vmem>>, vector<1x128xf32>
    %12 = vector.shape_cast %9 : vector<8x18x128xf32> to vector<144x128xf32>
    %cst = arith.constant dense<0.000000e+00> : vector<144x128xf32>
    %13 = tpu.matmul %12, %10, %cst {dimension_numbers = #tpu.dot_dimension_numbers<[1], [0], [0], [1], [0, 0, 1, 1], [], []>} : vector<144x128xf32>, vector<128x128xf32>, vector<144x128xf32> -> vector<144x128xf32>
    %14 = vector.broadcast %11 : vector<1x128xf32> to vector<144x128xf32>
    %15 = arith.addf %13, %14 : vector<144x128xf32>
    %cst_7 = arith.constant 0.000000e+00 : f32
    %16 = vector.broadcast %cst_7 : f32 to vector<144x128xf32>
    %17 = arith.maximumf %15, %16 : vector<144x128xf32>
    %18 = vector.shape_cast %17 : vector<144x128xf32> to vector<8x18x128xf32>
    %c0_8 = arith.constant 0 : index
    %c0_9 = arith.constant 0 : index
    %c0_10 = arith.constant 0 : index
    %c0_11 = arith.constant 0 : index
    %19 = vector.load %arg3[%c0_8, %c0_9, %c0_10, %c0_11] : memref<1x1x18x128xf32, #tpu.memory_space<vmem>>, vector<1x1x18x128xf32>
    %20 = vector.shape_cast %19 : vector<1x1x18x128xf32> to vector<18x128xf32>
    %cst_12 = arith.constant dense<0.000000e+00> : vector<18x128xf32>
    %21 = tpu.matmul %20, %10, %cst_12 {dimension_numbers = #tpu.dot_dimension_numbers<[1], [0], [0], [1], [0, 0, 1, 1], [], []>} : vector<18x128xf32>, vector<128x128xf32>, vector<18x128xf32> -> vector<18x128xf32>
    %22 = vector.broadcast %11 : vector<1x128xf32> to vector<18x128xf32>
    %23 = arith.addf %21, %22 : vector<18x128xf32>
    %cst_13 = arith.constant 0.000000e+00 : f32
    %24 = vector.broadcast %cst_13 : f32 to vector<18x128xf32>
    %25 = arith.maximumf %23, %24 : vector<18x128xf32>
    %c0_14 = arith.constant 0 : index
    %c0_15 = arith.constant 0 : index
    %c0_16 = arith.constant 0 : index
    %c0_17 = arith.constant 0 : index
    %26 = vector.load %arg4[%c0_14, %c0_15, %c0_16, %c0_17] : memref<1x1x18x128xf32, #tpu.memory_space<vmem>>, vector<1x1x18x128xf32>
    %27 = vector.shape_cast %26 : vector<1x1x18x128xf32> to vector<18x128xf32>
    %cst_18 = arith.constant dense<0.000000e+00> : vector<18x128xf32>
    %28 = tpu.matmul %27, %10, %cst_18 {dimension_numbers = #tpu.dot_dimension_numbers<[1], [0], [0], [1], [0, 0, 1, 1], [], []>} : vector<18x128xf32>, vector<128x128xf32>, vector<18x128xf32> -> vector<18x128xf32>
    %29 = vector.broadcast %11 : vector<1x128xf32> to vector<18x128xf32>
    %30 = arith.addf %28, %29 : vector<18x128xf32>
    %cst_19 = arith.constant 0.000000e+00 : f32
    %31 = vector.broadcast %cst_19 : f32 to vector<18x128xf32>
    %32 = arith.maximumf %30, %31 : vector<18x128xf32>
    %33 = vector.shape_cast %7 : vector<18x128xf32> to vector<1x18x128xf32>
    %34 = vector.broadcast %33 : vector<1x18x128xf32> to vector<8x18x128xf32>
    %35 = arith.mulf %18, %34 : vector<8x18x128xf32>
    %c0_i32 = arith.constant 0 : i32
    %36 = arith.cmpi sgt, %arg1, %c0_i32 : i32
    %37 = arith.mulf %25, %7 : vector<18x128xf32>
    %cst_20 = arith.constant 0.000000e+00 : f32
    %38 = vector.broadcast %cst_20 : f32 to vector<18x128xf32>
    %39 = arith.select %36, %37, %38 : vector<18x128xf32>
    %c1_i32_21 = arith.constant 1 : i32
    %40 = arith.cmpi slt, %arg1, %c1_i32_21 : i32
    %41 = arith.mulf %32, %7 : vector<18x128xf32>
    %cst_22 = arith.constant 0.000000e+00 : f32
    %42 = vector.broadcast %cst_22 : f32 to vector<18x128xf32>
    %43 = arith.select %40, %41, %42 : vector<18x128xf32>
    %44 = vector.shape_cast %39 : vector<18x128xf32> to vector<1x18x128xf32>
    %45 = vector.shape_cast %43 : vector<18x128xf32> to vector<1x18x128xf32>
    %46 = tpu.concatenate %44, %35, %45 in 0 : vector<1x18x128xf32>, vector<8x18x128xf32>, vector<1x18x128xf32> -> vector<10x18x128xf32>
    %c0_23 = arith.constant 0 : index
    %c0_24 = arith.constant 0 : index
    %47 = vector.load %arg7[%c0_23, %c0_24] : memref<9x128xf32, #tpu.memory_space<vmem>>, vector<9x128xf32>
    %cst_25 = arith.constant 0.000000e+00 : f32
    %48 = vector.broadcast %cst_25 : f32 to vector<8x16x128xf32>
    %49 = vector.extract_strided_slice %46 {offsets = [0, 0, 0], sizes = [10, 16, 128], strides = [1, 1, 1]} : vector<10x18x128xf32> to vector<10x16x128xf32>
    %50 = vector.extract_strided_slice %49 {offsets = [0, 0, 0], sizes = [8, 16, 128], strides = [1, 1, 1]} : vector<10x16x128xf32> to vector<8x16x128xf32>
    %51 = vector.extract_strided_slice %47 {offsets = [0, 0], sizes = [1, 128], strides = [1, 1]} : vector<9x128xf32> to vector<1x128xf32>
    %52 = vector.shape_cast %51 : vector<1x128xf32> to vector<128xf32>
    %53 = vector.shape_cast %52 : vector<128xf32> to vector<1x1x128xf32>
    %54 = vector.broadcast %53 : vector<1x1x128xf32> to vector<8x16x128xf32>
    %55 = arith.mulf %50, %54 : vector<8x16x128xf32>
    %56 = arith.addf %48, %55 : vector<8x16x128xf32>
    %57 = vector.extract_strided_slice %49 {offsets = [1, 0, 0], sizes = [8, 16, 128], strides = [1, 1, 1]} : vector<10x16x128xf32> to vector<8x16x128xf32>
    %58 = vector.extract_strided_slice %47 {offsets = [3, 0], sizes = [1, 128], strides = [1, 1]} : vector<9x128xf32> to vector<1x128xf32>
    %59 = vector.shape_cast %58 : vector<1x128xf32> to vector<128xf32>
    %60 = vector.shape_cast %59 : vector<128xf32> to vector<1x1x128xf32>
    %61 = vector.broadcast %60 : vector<1x1x128xf32> to vector<8x16x128xf32>
    %62 = arith.mulf %57, %61 : vector<8x16x128xf32>
    %63 = arith.addf %56, %62 : vector<8x16x128xf32>
    %64 = vector.extract_strided_slice %49 {offsets = [2, 0, 0], sizes = [8, 16, 128], strides = [1, 1, 1]} : vector<10x16x128xf32> to vector<8x16x128xf32>
    %65 = vector.extract_strided_slice %47 {offsets = [6, 0], sizes = [1, 128], strides = [1, 1]} : vector<9x128xf32> to vector<1x128xf32>
    %66 = vector.shape_cast %65 : vector<1x128xf32> to vector<128xf32>
    %67 = vector.shape_cast %66 : vector<128xf32> to vector<1x1x128xf32>
    %68 = vector.broadcast %67 : vector<1x1x128xf32> to vector<8x16x128xf32>
    %69 = arith.mulf %64, %68 : vector<8x16x128xf32>
    %70 = arith.addf %63, %69 : vector<8x16x128xf32>
    %71 = vector.extract_strided_slice %46 {offsets = [0, 1, 0], sizes = [10, 16, 128], strides = [1, 1, 1]} : vector<10x18x128xf32> to vector<10x16x128xf32>
    %72 = vector.extract_strided_slice %71 {offsets = [0, 0, 0], sizes = [8, 16, 128], strides = [1, 1, 1]} : vector<10x16x128xf32> to vector<8x16x128xf32>
    %73 = vector.extract_strided_slice %47 {offsets = [1, 0], sizes = [1, 128], strides = [1, 1]} : vector<9x128xf32> to vector<1x128xf32>
    %74 = vector.shape_cast %73 : vector<1x128xf32> to vector<128xf32>
    %75 = vector.shape_cast %74 : vector<128xf32> to vector<1x1x128xf32>
    %76 = vector.broadcast %75 : vector<1x1x128xf32> to vector<8x16x128xf32>
    %77 = arith.mulf %72, %76 : vector<8x16x128xf32>
    %78 = arith.addf %70, %77 : vector<8x16x128xf32>
    %79 = vector.extract_strided_slice %71 {offsets = [1, 0, 0], sizes = [8, 16, 128], strides = [1, 1, 1]} : vector<10x16x128xf32> to vector<8x16x128xf32>
    %80 = vector.extract_strided_slice %47 {offsets = [4, 0], sizes = [1, 128], strides = [1, 1]} : vector<9x128xf32> to vector<1x128xf32>
    %81 = vector.shape_cast %80 : vector<1x128xf32> to vector<128xf32>
    %82 = vector.shape_cast %81 : vector<128xf32> to vector<1x1x128xf32>
    %83 = vector.broadcast %82 : vector<1x1x128xf32> to vector<8x16x128xf32>
    %84 = arith.mulf %79, %83 : vector<8x16x128xf32>
    %85 = arith.addf %78, %84 : vector<8x16x128xf32>
    %86 = vector.extract_strided_slice %71 {offsets = [2, 0, 0], sizes = [8, 16, 128], strides = [1, 1, 1]} : vector<10x16x128xf32> to vector<8x16x128xf32>
    %87 = vector.extract_strided_slice %47 {offsets = [7, 0], sizes = [1, 128], strides = [1, 1]} : vector<9x128xf32> to vector<1x128xf32>
    %88 = vector.shape_cast %87 : vector<1x128xf32> to vector<128xf32>
    %89 = vector.shape_cast %88 : vector<128xf32> to vector<1x1x128xf32>
    %90 = vector.broadcast %89 : vector<1x1x128xf32> to vector<8x16x128xf32>
    %91 = arith.mulf %86, %90 : vector<8x16x128xf32>
    %92 = arith.addf %85, %91 : vector<8x16x128xf32>
    %93 = vector.extract_strided_slice %46 {offsets = [0, 2, 0], sizes = [10, 16, 128], strides = [1, 1, 1]} : vector<10x18x128xf32> to vector<10x16x128xf32>
    %94 = vector.extract_strided_slice %93 {offsets = [0, 0, 0], sizes = [8, 16, 128], strides = [1, 1, 1]} : vector<10x16x128xf32> to vector<8x16x128xf32>
    %95 = vector.extract_strided_slice %47 {offsets = [2, 0], sizes = [1, 128], strides = [1, 1]} : vector<9x128xf32> to vector<1x128xf32>
    %96 = vector.shape_cast %95 : vector<1x128xf32> to vector<128xf32>
    %97 = vector.shape_cast %96 : vector<128xf32> to vector<1x1x128xf32>
    %98 = vector.broadcast %97 : vector<1x1x128xf32> to vector<8x16x128xf32>
    %99 = arith.mulf %94, %98 : vector<8x16x128xf32>
    %100 = arith.addf %92, %99 : vector<8x16x128xf32>
    %101 = vector.extract_strided_slice %93 {offsets = [1, 0, 0], sizes = [8, 16, 128], strides = [1, 1, 1]} : vector<10x16x128xf32> to vector<8x16x128xf32>
    %102 = vector.extract_strided_slice %47 {offsets = [5, 0], sizes = [1, 128], strides = [1, 1]} : vector<9x128xf32> to vector<1x128xf32>
    %103 = vector.shape_cast %102 : vector<1x128xf32> to vector<128xf32>
    %104 = vector.shape_cast %103 : vector<128xf32> to vector<1x1x128xf32>
    %105 = vector.broadcast %104 : vector<1x1x128xf32> to vector<8x16x128xf32>
    %106 = arith.mulf %101, %105 : vector<8x16x128xf32>
    %107 = arith.addf %100, %106 : vector<8x16x128xf32>
    %108 = vector.extract_strided_slice %93 {offsets = [2, 0, 0], sizes = [8, 16, 128], strides = [1, 1, 1]} : vector<10x16x128xf32> to vector<8x16x128xf32>
    %109 = vector.extract_strided_slice %47 {offsets = [8, 0], sizes = [1, 128], strides = [1, 1]} : vector<9x128xf32> to vector<1x128xf32>
    %110 = vector.shape_cast %109 : vector<1x128xf32> to vector<128xf32>
    %111 = vector.shape_cast %110 : vector<128xf32> to vector<1x1x128xf32>
    %112 = vector.broadcast %111 : vector<1x1x128xf32> to vector<8x16x128xf32>
    %113 = arith.mulf %108, %112 : vector<8x16x128xf32>
    %114 = arith.addf %107, %113 : vector<8x16x128xf32>
    %c0_26 = arith.constant 0 : index
    %c0_27 = arith.constant 0 : index
    %115 = vector.load %arg8[%c0_26, %c0_27] : memref<1x128xf32, #tpu.memory_space<vmem>>, vector<1x128xf32>
    %116 = vector.shape_cast %115 : vector<1x128xf32> to vector<1x1x128xf32>
    %117 = vector.broadcast %116 : vector<1x1x128xf32> to vector<8x16x128xf32>
    %118 = arith.addf %114, %117 : vector<8x16x128xf32>
    %cst_28 = arith.constant 0.000000e+00 : f32
    %119 = vector.broadcast %cst_28 : f32 to vector<8x16x128xf32>
    %120 = arith.maximumf %118, %119 : vector<8x16x128xf32>
    %121 = vector.shape_cast %120 : vector<8x16x128xf32> to vector<128x128xf32>
    %c0_29 = arith.constant 0 : index
    %c0_30 = arith.constant 0 : index
    %122 = vector.load %arg9[%c0_29, %c0_30] : memref<128x128xf32, #tpu.memory_space<vmem>>, vector<128x128xf32>
    %cst_31 = arith.constant dense<0.000000e+00> : vector<128x128xf32>
    %123 = tpu.matmul %121, %122, %cst_31 {dimension_numbers = #tpu.dot_dimension_numbers<[1], [0], [0], [1], [0, 0, 1, 1], [], []>} : vector<128x128xf32>, vector<128x128xf32>, vector<128x128xf32> -> vector<128x128xf32>
    %c0_32 = arith.constant 0 : index
    %c0_33 = arith.constant 0 : index
    %124 = vector.load %arg10[%c0_32, %c0_33] : memref<1x128xf32, #tpu.memory_space<vmem>>, vector<1x128xf32>
    %125 = vector.broadcast %124 : vector<1x128xf32> to vector<128x128xf32>
    %126 = arith.addf %123, %125 : vector<128x128xf32>
    %cst_34 = arith.constant 0.000000e+00 : f32
    %127 = vector.broadcast %cst_34 : f32 to vector<128x128xf32>
    %128 = arith.maximumf %126, %127 : vector<128x128xf32>
    %129 = vector.extract_strided_slice %9 {offsets = [0, 1, 0], sizes = [8, 16, 128], strides = [1, 1, 1]} : vector<8x18x128xf32> to vector<8x16x128xf32>
    %130 = vector.shape_cast %129 : vector<8x16x128xf32> to vector<128x128xf32>
    %131 = arith.addf %128, %130 : vector<128x128xf32>
    %132 = vector.shape_cast %131 : vector<128x128xf32> to vector<8x16x128xf32>
    %c0_35 = arith.constant 0 : index
    %c0_36 = arith.constant 0 : index
    %c0_37 = arith.constant 0 : index
    %c0_38 = arith.constant 0 : index
    %133 = vector.load %arg11[%c0_35, %c0_36, %c0_37, %c0_38] : memref<1x8x16x128xf32, #tpu.memory_space<vmem>>, vector<1x8x16x128xf32>
    %134 = vector.shape_cast %133 : vector<1x8x16x128xf32> to vector<8x16x128xf32>
    %135 = vector.shape_cast %132 : vector<8x16x128xf32> to vector<1x8x16x128xf32>
    tpu.vector_store %arg11[%c0_35, %c0_36, %c0_37, %c0_38], %135 {strides = array<i32>} : memref<1x8x16x128xf32, #tpu.memory_space<vmem>>, vector<1x8x16x128xf32>,
    return
  }
  func.func @transform_0(%arg0: i32, %arg1: i32) -> (i32, i32, i32, i32) {
    %c0_i32 = arith.constant 0 : i32
    %c0_i32_0 = arith.constant 0 : i32
    %c0_i32_1 = arith.constant 0 : i32
    return %arg0, %arg1, %c0_i32, %c0_i32_0 : i32, i32, i32, i32
  }
  func.func @transform_1(%arg0: i32, %arg1: i32) -> (i32, i32, i32, i32) {
    %c8_i32 = arith.constant 8 : i32
    %0 = arith.muli %arg1, %c8_i32 : i32
    %c1_i32 = arith.constant 1 : i32
    %1 = arith.subi %0, %c1_i32 : i32
    %c0_i32 = arith.constant 0 : i32
    %2 = arith.maxsi %1, %c0_i32 : i32
    %c0_i32_0 = arith.constant 0 : i32
    %c0_i32_1 = arith.constant 0 : i32
    %c0_i32_2 = arith.constant 0 : i32
    return %arg0, %2, %c0_i32_0, %c0_i32_1 : i32, i32, i32, i32
  }
  func.func @transform_2(%arg0: i32, %arg1: i32) -> (i32, i32, i32, i32) {
    %c1_i32 = arith.constant 1 : i32
    %0 = arith.addi %arg1, %c1_i32 : i32
    %c8_i32 = arith.constant 8 : i32
    %1 = arith.muli %0, %c8_i32 : i32
    %c15_i32 = arith.constant 15 : i32
    %2 = arith.minsi %1, %c15_i32 : i32
    %c0_i32 = arith.constant 0 : i32
    %c0_i32_0 = arith.constant 0 : i32
    %c0_i32_1 = arith.constant 0 : i32
    return %arg0, %2, %c0_i32, %c0_i32_0 : i32, i32, i32, i32
  }
  func.func @transform_3(%arg0: i32, %arg1: i32) -> (i32, i32) {
    %c0_i32 = arith.constant 0 : i32
    %c0_i32_0 = arith.constant 0 : i32
    %c0_i32_1 = arith.constant 0 : i32
    return %c0_i32, %c0_i32_0 : i32, i32
  }
  func.func @transform_4(%arg0: i32, %arg1: i32) -> (i32, i32) {
    %c0_i32 = arith.constant 0 : i32
    %c0_i32_0 = arith.constant 0 : i32
    %c0_i32_1 = arith.constant 0 : i32
    return %c0_i32, %c0_i32_0 : i32, i32
  }
  func.func @transform_5(%arg0: i32, %arg1: i32) -> (i32, i32) {
    %c0_i32 = arith.constant 0 : i32
    %c0_i32_0 = arith.constant 0 : i32
    %c0_i32_1 = arith.constant 0 : i32
    return %c0_i32, %c0_i32_0 : i32, i32
  }
  func.func @transform_6(%arg0: i32, %arg1: i32) -> (i32, i32) {
    %c0_i32 = arith.constant 0 : i32
    %c0_i32_0 = arith.constant 0 : i32
    %c0_i32_1 = arith.constant 0 : i32
    return %c0_i32, %c0_i32_0 : i32, i32
  }
  func.func @transform_7(%arg0: i32, %arg1: i32) -> (i32, i32) {
    %c0_i32 = arith.constant 0 : i32
    %c0_i32_0 = arith.constant 0 : i32
    %c0_i32_1 = arith.constant 0 : i32
    return %c0_i32, %c0_i32_0 : i32, i32
  }
  func.func @transform_8(%arg0: i32, %arg1: i32) -> (i32, i32) {
    %c0_i32 = arith.constant 0 : i32
    %c0_i32_0 = arith.constant 0 : i32
    %c0_i32_1 = arith.constant 0 : i32
    return %c0_i32, %c0_i32_0 : i32, i32
  }
  func.func @transform_9(%arg0: i32, %arg1: i32) -> (i32, i32, i32, i32) {
    %c0_i32 = arith.constant 0 : i32
    %c0_i32_0 = arith.constant 0 : i32
    %c0_i32_1 = arith.constant 0 : i32
    return %arg0, %arg1, %c0_i32, %c0_i32_0 : i32, i32, i32, i32
  }
}

</mosaic_0001>

<bundles_post_ra>
// kernel: inverted_block_forward.1
= control target key start
LH: loop header
LB: loop body
LE: loop exit
PB: predicated region body
PF: predicated region fallthrough
CT: control target
= control target key end

     0   :  { %s4542_s30 = smov 0   ;;  %s4544_s10 = smov 0   ;;  %s5976_s0 = inlined_call_operand.vmem [shape: f32[2,16,18,128], index: 0, kind: input, shape index: {}, may-alias: {0,1,2}]   ;;  %s5977_s1 = inlined_call_operand.vmem [shape: f32[2,16,18,128], index: 1, kind: input, shape index: {}, may-alias: {0,1,2}]   ;;  %s5978_s2 = inlined_call_operand.vmem [shape: f32[2,16,18,128], index: 2, kind: input, shape index: {}, may-alias: {0,1,2}]   ;;  %s5979_s3 = inlined_call_operand.vmem [shape: f32[128,128], index: 3, kind: input, shape index: {}]   ;;  %s5980_s4 = inlined_call_operand.vmem [shape: f32[1,128], index: 4, kind: input, shape index: {}]   ;;  %s5981_s5 = inlined_call_operand.vmem [shape: f32[9,128], index: 5, kind: input, shape index: {}]   ;;  %s5982_s6 = inlined_call_operand.vmem [shape: f32[1,128], index: 6, kind: input, shape index: {}]   ;;  %s5983_s7 = inlined_call_operand.vmem [shape: f32[128,128], index: 7, kind: input, shape index: {}]   ;;  %s5984_s8 = inlined_call_operand.vmem [shape: f32[1,128], index: 8, kind: input, shape index: {}]   ;;  %s5985_s9 = inlined_call_operand.vmem [shape: f32[2,16,16,128], index: 9, kind: output, shape index: {}]  }
   0x1   :  { %s4546_s11 = smov 0   ;;  %s4548_s12 = smov 0  }
   0x2   :  { %s4550_s13 = smov 0  }
   0x3 LB: > { %s28_s14 = sadd.s32 1, %s4473_s11  ;;  %s31_s15 = sadd.s32 1, %s4477_s12  ;;  %s4481_s13 = sphi %s4550_s13, %s19_s13   ;;  %s4477_s12 = sphi %s4548_s12, %s6039_s12   ;;  %s4473_s11 = sphi %s4546_s11, %s6038_s11   ;;  %s4469_s10 = sphi %s4544_s10, %s6037_s10   ;;  %s4465_s30 = sphi %s4542_s30, %s6036_s30  }
   0x4   : > { %p29_p0 = scmp.ge.s32.totalorder %s28_s14, 2  ;;  %p3893_p1 = scmp.ge.s32.totalorder %s4481_s13, 1 }
   0x5   : > { %p373_p2 = scmp.lt.s32.totalorder %s4481_s13, 5 }
   0x6   : > { %s6041_s14 = smov (%p29_p0, %s28_s14), 0  ;;  %s6043_s15 = smov (!%p29_p0, %s31_s15), %s4477_s12 }
   0x7   : > { %p374_p3 = pnand %p3893_p1, %p373_p2  ;;  %p33_p4 = scmp.ge.s32.totalorder %s6043_s15, 2 }
   0x9   : > { %s6045_s15 = smov (%p33_p4, %s6043_s15), 0  ;;  %377 = sbr.rel (%p374_p3) target bundleno = 721 (0x2d1), region = 56 }
   0xa   : > { %6001 = sst [smem:[#allocation2_spill]] %s6045_s15 }
  0x10   : > { %v544_v0 = vld [vmem:[%s5979_s3] sm:$0xff]  ;;  %v545_v1 = vld [vmem:[%s5979_s3 + $0x8] sm:$0xff]  ;;  %v546_v2 = vld [vmem:[%s5979_s3 + $0x10] sm:$0xff]  ;;  %s4584_s22 = sshll.u32 %s4465_s30, 3  ;;  %p446_p5 = scmp.lt.s32.totalorder %s4469_s10, 1  ;;  %v501_v3 = vlaneseq  ;;  %v4483_v6 = vmov 0.0|0.0  }
  0x11   : > { %v4586_v4 = vpack.c.bf16 %v545_v1, %v544_v0  ;;  %v547_v5 = vld [vmem:[%s5979_s3 + $0x18] sm:$0xff]  ;;  %4262 = vmatprep.subr.bf16.mxu1 %v4483_v6  ;;  %p448_p6 = scmp.lt.s32.totalorder %s4584_s22, 15  ;;  %v548_v8 = vld [vmem:[%s5979_s3 + $0x20] sm:$0xff]  ;;  %v549_v9 = vld [vmem:[%s5979_s3 + $0x28] sm:$0xff]  ;;  %v4484_v10 = vmov 1983009808  }
  0x12   : > { %v4593_v7 = vpack.c.bf16 %v547_v5, %v546_v2  ;;  %s6047_s10 = smov (!%p446_p5, %s4469_s10), 1  ;;  %v587_v11 = vunpack.c.l.s4 %v4484_v10  ;;  %v4608_v12 = vshrl.u32 %v501_v3, 7  ;;  %v550_v13 = vld [vmem:[%s5979_s3 + $0x30] sm:$0xff]  ;;  %s4619_s19 = sadd.s32 4294967295, %s4584_s22  ;;  %v4622_v15 = vpack.c.bf16 %v549_v9, %v548_v8  ;;  %v551_v16 = vld [vmem:[%s5979_s3 + $0x38] sm:$0xff]  ;;  %v552_v17 = vld [vmem:[%s5979_s3 + $0x40] sm:$0xff] }
  0x13   : > { %4231 = vmatprep.subr.bf16.mxu0 %v4586_v4  ;;  %4264 = vmatpush3.bf16.msra.mxu1 %v4586_v4  ;;  %s4606_s29 = scalar_select %p448_p6, %s4584_s22, 15  ;;  %v553_v18 = vld [vmem:[%s5979_s3 + $0x48] sm:$0xff]  ;;  %vm4485_vm0 = vmmov 0   ;;  %v4486_v19 = vmov 0.0   ;;  %v554_v20 = vld [vmem:[%s5979_s3 + $0x50] sm:$0xff]  ;;  %v555_v21 = vld [vmem:[%s5979_s3 + $0x58] sm:$0xff]  ;;  %v4663_v27 = vpack.c.bf16 %v551_v16, %v550_v13 }
  0x14   : > { %4233 = vmatpush3.bf16.msra.mxu0 %v4586_v4  ;;  %4265 = vmatprep.subr.bf16.mxu1 %v4483_v6  ;;  %s4616_s18 = smul.u32 48, %s6047_s10  ;;  %v588_v14 = vunpack.c.0.s8 %v587_v11  ;;  %v556_v22 = vld [vmem:[%s5979_s3 + $0x60] sm:$0xff]  ;;  %p458_p7 = scmp.gt.s32.totalorder %s4619_s19, 0  ;;  %v557_v23 = vld [vmem:[%s5979_s3 + $0x68] sm:$0xff]  ;;  %v558_v24 = vld [vmem:[%s5979_s3 + $0x70] sm:$0xff]  ;;  %v4671_v28 = vpack.c.bf16 %v553_v18, %v552_v17  ;;  %v4673_v29 = vpack.c.bf16 %v555_v21, %v554_v20  ;;  %vm505_vm1 = vcmp.ge.s32.totalorder %v4608_v12, 1 }
  0x15   : > { %4235 = vmatprep.subr.bf16.mxu0 %v4593_v7  ;;  %s4342_s27 = smul.u32 3, %s4606_s29  ;;  %4124 = vmatprep.mubr.msk.f32.mxu1 %vm4485_vm0, %v4486_v19  ;;  %v559_v25 = vld [vmem:[%s5979_s3 + $0x78] sm:$0xff]  ;;  %p3898_p8 = scmp.lt.s32.totalorder %s4619_s19, 15  ;;  %v4675_v30 = vpack.c.bf16 %v557_v23, %v556_v22  ;;  %vm2737_vm4 = vcmask 1046528   ;;  %vm3110_vm5 = vcmask 1045504  }
  0x16   : > { %v4658_v26 = vsub.s32 %v588_v14, %v4608_v12  ;;  %v4677_v31 = vpack.c.bf16 %v559_v25, %v558_v24  ;;  %p2131_p10 = scmp.gt.s32.totalorder %s4465_s30, 0  ;;  %p2141_p11 = scmp.lt.s32.totalorder %s4465_s30, 1 }
  0x17   : > { %4267 = vmatpush3.bf16.msra.mxu1 %v4593_v7  ;;  %s452_s17 = sadd.s32 %s4616_s18, %s4342_s27  ;;  %s3910_s26 = sshll.u32 %s4606_s29, 1 }
  0x18   : > { %4237 = vmatpush3.bf16.msra.mxu0 %v4593_v7  ;;  %4268 = vmatprep.subr.bf16.mxu1 %v4483_v6  ;;  %s3895_s20 = sshll.u32 %s452_s17, 3  ;;  %s3928_s17 = sadd.s32 8, %s4584_s22 }
  0x19   : > { %4239 = vmatprep.subr.bf16.mxu0 %v4622_v15  ;;  %s4668_s23 = scalar_lea.vmem %s5976_s0, %s3895_s20  ;;  %p4798_p9 = scmp.lt.s32.totalorder %s3928_s17, 15 }
  0x1a   : > { %v520_v32 = vld [vmem:[%s4668_s23] sm:$0xff]  ;;  %v521_v33 = vld [vmem:[%s4668_s23 + $0x8] sm:$0xff]  ;;  %v4435_v34 = vld.sshfl [vmem:[%s4668_s23 + $0x10] sm:$0x3 pattern:$0x76325410] }
  0x1b   : > { %s459_s27 = scalar_select %p458_p7, %s4619_s19, 0  ;;  %4270 = vmatpush3.bf16.msra.mxu1 %v4622_v15  ;;  %v585_v35 = vcombine.high %v520_v32, %v520_v32  ;;  %v592_v36 = vrot.slane %v520_v32, %v4658_v26  ;;  %v602_v37 = vcombine.high %v521_v33, %v521_v33  ;;  %v609_v38 = vrot.slane %v521_v33, %v4658_v26  ;;  %v523_v39 = vld [vmem:[%s4668_s23 + $0x18] sm:$0xff]  ;;  %v524_v40 = vld [vmem:[%s4668_s23 + $0x20] sm:$0xff]  ;;  %v526_v59 = vld [vmem:[%s4668_s23 + $0x30] sm:$0xff] }
  0x1c   : > { %4241 = vmatpush3.bf16.msra.mxu0 %v4622_v15  ;;  %4271 = vmatprep.subr.bf16.mxu1 %v4483_v6  ;;  %v626_v41 = vcombine.high %v523_v39, %v523_v39  ;;  %v633_v42 = vrot.slane %v523_v39, %v4658_v26  ;;  %v643_v50 = vcombine.high %v524_v40, %v524_v40  ;;  %v4436_v55 = vld.sshfl [vmem:[%s4668_s23 + $0x28] sm:$0x3 pattern:$0x76325410]  ;;  %v527_v9 = vld [vmem:[%s4668_s23 + $0x38] sm:$0xff]  ;;  %v530_v39 = vld [vmem:[%s4668_s23 + $0x50] sm:$0xff] }
  0x1d   : > { %4243 = vmatprep.subr.bf16.mxu0 %v4663_v27  ;;  %v599_v43 = vrot.slane %v585_v35, %v4658_v26  ;;  %v600_v44 = vcombine.high %v592_v36, %v592_v36  ;;  %v616_v45 = vrot.slane %v602_v37, %v4658_v26  ;;  %v617_v46 = vcombine.high %v609_v38, %v609_v38  ;;  %s6049_s27 = smov (!%p3898_p8, %s459_s27), 15  ;;  %v4437_v25 = vld.sshfl [vmem:[%s4668_s23 + $0x40] sm:$0x3 pattern:$0x76325410]  ;;  %s6051_s17 = smov (!%p4798_p9, %s3928_s17), 15 }
  0x1e   : > { %v640_v47 = vrot.slane %v626_v41, %v4658_v26  ;;  %v641_v48 = vcombine.high %v633_v42, %v633_v42  ;;  %v953_v49 = vcombine.low %v4435_v34, %v633_v42  ;;  %v650_v1 = vrot.slane %v524_v40, %v4658_v26  ;;  %s4344_s19 = smul.u32 3, %s6049_s27  ;;  %s6053_s17 = smov (!%p4798_p9, %s6051_s17), 15 }
  0x1f   : > { %4273 = vmatpush3.bf16.msra.mxu1 %v4663_v27  ;;  %v601_v51 = vcombine.high %v599_v43, %v599_v43  ;;  %v919_v52 = vcombine.low %v592_v36, %v600_v44  ;;  %v618_v53 = vcombine.high %v616_v45, %v616_v45  ;;  %v936_v54 = vcombine.low %v609_v38, %v617_v46  ;;  %v529_v38 = vld [vmem:[%s4668_s23 + $0x48] sm:$0xff]  ;;  %s4847_s22 = smul.u32 3, %s6053_s17  ;;  %s3911_s28 = sshll.u32 %s6047_s10, 5 }
  0x20   : > { %4245 = vmatpush3.bf16.msra.mxu0 %v4663_v27  ;;  %4274 = vmatprep.subr.bf16.mxu1 %v4483_v6  ;;  %v954_v56 = vcombine.low %v641_v48, %v640_v47  ;;  %v961_v57 = vrot.slane %v953_v49, %v4658_v26  ;;  %v642_v58 = vcombine.high %v640_v47, %v640_v47  ;;  %s4728_s24 = sadd.s32 %s4344_s19, %s4616_s18 }
  0x21   : > { %4247 = vmatprep.subr.bf16.mxu0 %v4671_v28  ;;  %v920_v60 = vcombine.low %v599_v43, %v601_v51  ;;  %v927_v61 = vrot.slane %v919_v52, %v4658_v26  ;;  %v937_v62 = vcombine.low %v616_v45, %v618_v53  ;;  %v944_v63 = vrot.slane %v936_v54, %v4658_v26  ;;  %s3903_s25 = sshll.u32 %s4728_s24, 3  ;;  %v4438_v51 = vld.sshfl [vmem:[%s4668_s23 + $0x58] sm:$0x3 pattern:$0x76325410]  ;;  %s483_s15 = sadd.s32 %s4847_s22, %s4616_s18 }
  0x22   : > { %v968_v0 = vrot.slane %v954_v56, %v4658_v26  ;;  %v657_v2 = vrot.slane %v643_v50, %v4658_v26  ;;  %v674_v8 = vrot.slane %v526_v59, %v4658_v26  ;;  %v667_v10 = vcombine.high %v526_v59, %v526_v59  ;;  %s4757_s16 = scalar_lea.vmem %s5977_s1, %s3903_s25  ;;  %v532_v59 = vld [vmem:[%s4668_s23 + $0x60] sm:$0xff]  ;;  %s3908_s21 = sshll.u32 %s483_s15, 3 }
  0x23   : > { %4276 = vmatpush3.bf16.msra.mxu1 %v4671_v28  ;;  %v934_v3 = vrot.slane %v920_v60, %v4658_v26  ;;  %v951_v5 = vrot.slane %v937_v62, %v4658_v26  ;;  %v658_v13 = vcombine.high %v650_v1, %v650_v1  ;;  %v970_v14 = vcombine.low %v642_v58, %v650_v1  ;;  %v533_v60 = vld [vmem:[%s4668_s23 + $0x68] sm:$0xff]  ;;  %s485_s19 = scalar_lea.vmem %s5978_s2, %s3908_s21 }
  0x24   : > { %4249 = vmatpush3.bf16.msra.mxu0 %v4671_v28  ;;  %4277 = vmatprep.subr.bf16.mxu1 %v4483_v6  ;;  %v4721_v11 = vcombine.low %v961_v57, %v968_v0  ;;  %v659_v18 = vcombine.high %v657_v2, %v657_v2  ;;  %v682_v20 = vcombine.high %v674_v8, %v674_v8  ;;  %v1812_v0 = vld [vmem:[%s4757_s16] sm:$0xff]  ;;  %s4938_s20 = scalar_select %p2131_p10, 1, 0 }
  0x25   : > { %4251 = vmatprep.subr.bf16.mxu0 %v4673_v29  ;;  %v935_v16 = vcombine.low %v927_v61, %v934_v3  ;;  %v4724_v17 = vcombine.low %v944_v63, %v951_v5  ;;  %v971_v21 = vcombine.low %v658_v13, %v657_v2  ;;  %v978_v22 = vrot.slane %v970_v14, %v4658_v26  ;;  %s4987_s27 = scalar_select %p2141_p11, 1, 0 }
  0x26   : > { %v681_v23 = vrot.slane %v667_v10, %v4658_v26  ;;  %v691_v24 = vrot.slane %v527_v9, %v4658_v26  ;;  %v987_v32 = vcombine.low %v659_v18, %v4436_v55  ;;  %v988_v33 = vcombine.low %v674_v8, %v682_v20 }
  0x27   : > { %4279 = vmatpush3.bf16.msra.mxu1 %v4673_v29  ;;  %4065 = vmatprep.mubr.f32.mxu0 %v935_v16  ;;  %v684_v34 = vcombine.high %v527_v9, %v527_v9  ;;  %v985_v35 = vrot.slane %v971_v21, %v4658_v26  ;;  %v715_v46 = vrot.slane %v529_v38, %v4658_v26 }
  0x28   : > { %4253 = vmatpush3.bf16.msra.mxu0 %v4673_v29  ;;  %4280 = vmatprep.subr.bf16.mxu1 %v4483_v6  ;;  %v683_v36 = vcombine.high %v681_v23, %v681_v23  ;;  %v699_v37 = vcombine.high %v691_v24, %v691_v24  ;;  %v995_v40 = vrot.slane %v987_v32, %v4658_v26 }
  0x29   : > { %4255 = vmatprep.subr.bf16.mxu0 %v4675_v30  ;;  %v1002_v41 = vrot.slane %v988_v33, %v4658_v26  ;;  %v698_v42 = vrot.slane %v684_v34, %v4658_v26  ;;  %v4744_v43 = vcombine.low %v978_v22, %v985_v35  ;;  %v708_v49 = vcombine.high %v529_v38, %v529_v38  ;;  %v4439_v34 = vld.sshfl [vmem:[%s4668_s23 + $0x70] sm:$0x3 pattern:$0x76325410]  ;;  %v535_v35 = vld [vmem:[%s4668_s23 + $0x78] sm:$0xff] }
  0x2a   : > { %v1004_v44 = vcombine.low %v681_v23, %v683_v36  ;;  %v1005_v45 = vcombine.low %v691_v24, %v699_v37  ;;  %v732_v50 = vrot.slane %v530_v39, %v4658_v26  ;;  %v1022_v54 = vcombine.low %v4437_v25, %v715_v46  ;;  %v1813_v24 = vld [vmem:[%s4757_s16 + $0x8] sm:$0xff] }
  0x2b   : > { %4282 = vmatpush3.bf16.msra.mxu1 %v4675_v30  ;;  %v4748_v47 = vcombine.low %v995_v40, %v1002_v41  ;;  %v700_v48 = vcombine.high %v698_v42, %v698_v42  ;;  %v722_v56 = vrot.slane %v708_v49, %v4658_v26  ;;  %v723_v57 = vcombine.high %v715_v46, %v715_v46 }
  0x2c   : > { %4257 = vmatpush3.bf16.msra.mxu0 %v4675_v30  ;;  %4283 = vmatprep.subr.bf16.mxu1 %v4483_v6  ;;  %v1012_v52 = vrot.slane %v1004_v44, %v4658_v26  ;;  %v1019_v53 = vrot.slane %v1005_v45, %v4658_v26  ;;  %v725_v58 = vcombine.high %v530_v39, %v530_v39  ;;  %v536_v44 = vld [vmem:[%s4668_s23 + $0x80] sm:$0xff]  ;;  %v1814_v45 = vld [vmem:[%s4757_s16 + $0x10] sm:$0x3]  ;;  %s497_s16 = sadd.s32 %s3911_s28, %s3910_s26 }
  0x2d   : > { %4259 = vmatprep.subr.bf16.mxu0 %v4677_v31  ;;  %v1021_v55 = vcombine.low %v698_v42, %v700_v48  ;;  %v1036_v62 = vrot.slane %v1022_v54, %v4658_v26  ;;  %v740_v63 = vcombine.high %v732_v50, %v732_v50  ;;  %v724_v2 = vcombine.high %v722_v56, %v722_v56  ;;  %s3912_s22 = sshll.u32 %s497_s16, 3 }
  0x2e   : > { %v4765_v61 = vcombine.low %v1012_v52, %v1019_v53  ;;  %v1038_v3 = vcombine.low %v723_v57, %v722_v56  ;;  %v739_v5 = vrot.slane %v725_v58, %v4658_v26  ;;  %v749_v8 = vcombine.high %v532_v59, %v532_v59  ;;  %v4440_v58 = vld.sshfl [vmem:[%s4668_s23 + $0x88] sm:$0x3 pattern:$0x76325410]  ;;  %s5894_s15 = scalar_lea.vmem %s5985_s9, %s3912_s22 }
  0x2f   : > { %4285 = vmatpush3.bf16.msra.mxu1 %v4677_v31  ;;  %v1029_v1 = vrot.slane %v1021_v55, %v4658_v26  ;;  %v756_v9 = vrot.slane %v532_v59, %v4658_v26  ;;  %v766_v10 = vcombine.high %v533_v60, %v533_v60  ;;  %v1039_v14 = vcombine.low %v724_v2, %v732_v50  ;;  %v538_v59 = vld [vmem:[%s4668_s23 + $0x90] sm:$0xff] }
  0x30   : > { %4261 = vmatpush3.bf16.msra.mxu0 %v4677_v31  ;;  %4286 = vmatprep.subr.bf16.mxu1 %v4483_v6  ;;  %v1046_v16 = vrot.slane %v1038_v3, %v4658_v26  ;;  %v741_v18 = vcombine.high %v739_v5, %v739_v5  ;;  %v1055_v20 = vcombine.low %v740_v63, %v739_v5 }
  0x31   : > { %v4775_v13 = vcombine.low %v1029_v1, %v1036_v62  ;;  %v763_v21 = vrot.slane %v749_v8, %v4658_v26  ;;  %v764_v22 = vcombine.high %v756_v9, %v756_v9  ;;  %v773_v23 = vrot.slane %v533_v60, %v4658_v26 }
  0x32   : > { %4125 = vmatmul.mubr.f32.vlgmr.msra.gmra.mrb[0].mxu1 %v1812_v0  ;;  %v1053_v25 = vrot.slane %v1039_v14, %v4658_v26  ;;  %v1056_v32 = vcombine.low %v741_v18, %v4438_v51  ;;  %v780_v33 = vrot.slane %v766_v10, %v4658_v26  ;;  %v797_v51 = vrot.slane %v535_v35, %v4658_v26  ;;  %v539_v0 = vld [vmem:[%s4668_s23 + $0x98] sm:$0xff] }
  0x33   : > { %4066 = vmatmul.mubr.f32.vlgmr.msra.gmra.mrb[0].mxu0 %v4724_v17  ;;  %4288 = vmatpush3.bf16.msra.mxu1 %v4586_v4  ;;  %v1063_v17 = vrot.slane %v1055_v20, %v4658_v26  ;;  %v765_v4 = vcombine.high %v763_v21, %v763_v21  ;;  %v1072_v36 = vcombine.low %v756_v9, %v764_v22  ;;  %v4441_v20 = vld.sshfl [vmem:[%s4668_s23 + $0xa0] sm:$0x3 pattern:$0x76325410] }
  0x34   : > { %4068 = vmatprep.mubr.f32.mxu0 %v4721_v11  ;;  %4127 = vmatprep.mubr.msk.f32.mxu1 %vm4485_vm0, %v4486_v19  ;;  %v1054_v37 = vcombine.low %v1046_v16, %v1053_v25  ;;  %v1070_v38 = vrot.slane %v1056_v32, %v4658_v26  ;;  %v781_v39 = vcombine.high %v773_v23, %v773_v23 }
  0x35   : > { %4289 = vmatprep.subr.bf16.mxu1 %v4483_v6  ;;  %v782_v40 = vcombine.high %v780_v33, %v780_v33  ;;  %v1073_v41 = vcombine.low %v763_v21, %v765_v4  ;;  %v1080_v42 = vrot.slane %v1072_v36, %v4658_v26  ;;  %v790_v11 = vcombine.high %v535_v35, %v535_v35  ;;  %v541_v21 = vld [vmem:[%s4668_s23 + $0xa8] sm:$0xff] }
  0x36   : > { %4128 = vmatmul.mubr.f32.gmra.mrb[2].mxu1 %v1813_v24  ;;  %v1071_v46 = vcombine.low %v1063_v17, %v1070_v38  ;;  %v1089_v48 = vcombine.low %v773_v23, %v781_v39  ;;  %v814_v53 = vrot.slane %v536_v44, %v4658_v26  ;;  %v805_v55 = vcombine.high %v797_v51, %v797_v51 }
  0x37   : > { %4069 = vmatmul.mubr.f32.gmra.mrb[2].mxu0 %v4744_v43  ;;  %4291 = vmatpush3.bf16.msra.mxu1 %v4593_v7  ;;  %v1090_v49 = vcombine.low %v780_v33, %v782_v40  ;;  %v1087_v50 = vrot.slane %v1073_v41, %v4658_v26  ;;  %v804_v43 = vrot.slane %v790_v11, %v4658_v26 }
  0x38   : > { %4071 = vmatprep.mubr.f32.mxu0 %v4748_v47  ;;  %4130 = vmatprep.mubr.msk.f32.mxu1 %vm4485_vm0, %v4486_v19  ;;  %v1097_v7 = vrot.slane %v1089_v48, %v4658_v26  ;;  %v807_v47 = vcombine.high %v536_v44, %v536_v44  ;;  %v1106_v56 = vcombine.low %v4439_v34, %v797_v51 }
  0x39   : > { %4292 = vmatprep.subr.bf16.mxu1 %v4483_v6  ;;  %v1104_v52 = vrot.slane %v1090_v49, %v4658_v26  ;;  %v1088_v54 = vcombine.low %v1080_v42, %v1087_v50  ;;  %v806_v57 = vcombine.high %v804_v43, %v804_v43  ;;  %v822_v63 = vcombine.high %v814_v53, %v814_v53  ;;  %v4442_v49 = vld.sshfl [vmem:[%s4668_s23 + $0xb8] sm:$0x3 pattern:$0x76325410] }
  0x3a   : > { %4131 = vmatmul.mubr.f32.gmra.mrb[4].mxu1 %v1814_v45  ;;  %v821_v62 = vrot.slane %v807_v47, %v4658_v26  ;;  %v1107_v1 = vcombine.low %v805_v55, %v804_v43  ;;  %v1114_v2 = vrot.slane %v1106_v56, %v4658_v26  ;;  %v831_v10 = vcombine.high %v538_v59, %v538_v59 }
  0x3b   : > { %4072 = vmatmul.mubr.f32.gmra.mrb[4].mxu0 %v4765_v61  ;;  %4294 = vmatpush3.bf16.msra.mxu1 %v4622_v15  ;;  %v1105_v60 = vcombine.low %v1097_v7, %v1104_v52  ;;  %v1123_v3 = vcombine.low %v806_v57, %v814_v53  ;;  %v838_v15 = vrot.slane %v538_v59, %v4658_v26 }
  0x3c   : > { %4074 = vmatprep.mubr.f32.mxu0 %v4775_v13  ;;  %4295 = vmatprep.subr.bf16.mxu1 %v4483_v6  ;;  %v1124_v61 = vcombine.low %v822_v63, %v821_v62  ;;  %v823_v5 = vcombine.high %v821_v62, %v821_v62  ;;  %v1121_v8 = vrot.slane %v1107_v1, %v4658_v26  ;;  %v1898_v1 = vld [vmem:[%s485_s19] sm:$0xff] }
  0x3d   : > { %4165 = vmatprep.mubr.msk.f32.mxu1 %vm4485_vm0, %v4486_v19  ;;  %v1131_v9 = vrot.slane %v1123_v3, %v4658_v26  ;;  %v855_v13 = vrot.slane %v539_v0, %v4658_v26  ;;  %v846_v16 = vcombine.high %v838_v15, %v838_v15  ;;  %v845_v23 = vrot.slane %v831_v10, %v4658_v26  ;;  %v3470_v3 = vld [vmem:[%s5983_s7] sm:$0xff]  ;;  %v3475_v10 = vld [vmem:[%s5983_s7 + $0x28] sm:$0xff] }
  0x3e   : > { %v1138_v14 = vrot.slane %v1124_v61, %v4658_v26  ;;  %v1140_v18 = vcombine.low %v823_v5, %v4440_v58  ;;  %v1122_v22 = vcombine.low %v1114_v2, %v1121_v8  ;;  %v848_v34 = vcombine.high %v539_v0, %v539_v0  ;;  %v1899_v2 = vld [vmem:[%s485_s19 + $0x8] sm:$0xff]  ;;  %v3472_v5 = vld [vmem:[%s5983_s7 + $0x10] sm:$0xff] }
  0x3f   : > { %4075 = vmatmul.mubr.f32.gmra.mrb[6].mxu0 %v1054_v37  ;;  %4297 = vmatpush3.bf16.msra.mxu1 %v4663_v27  ;;  %v863_v24 = vcombine.high %v855_v13, %v855_v13  ;;  %v1141_v32 = vcombine.low %v838_v15, %v846_v16  ;;  %v847_v27 = vcombine.high %v845_v23, %v845_v23  ;;  %v542_v37 = vld [vmem:[%s4668_s23 + $0xb0] sm:$0xff]  ;;  %v3473_v15 = vld [vmem:[%s5983_s7 + $0x18] sm:$0xff] }
  0x40   : > { %4077 = vmatprep.mubr.f32.mxu0 %v1071_v46  ;;  %4298 = vmatprep.subr.bf16.mxu1 %v4483_v6  ;;  %v1139_v25 = vcombine.low %v1131_v9, %v1138_v14  ;;  %v1148_v33 = vrot.slane %v1140_v18, %v4658_v26  ;;  %v879_v17 = vrot.slane %v541_v21, %v4658_v26  ;;  %v3474_v9 = vld [vmem:[%s5983_s7 + $0x20] sm:$0xff]  ;;  %v3476_v14 = vld [vmem:[%s5983_s7 + $0x30] sm:$0xff]  ;;  %v3477_v16 = vld [vmem:[%s5983_s7 + $0x38] sm:$0xff] }
  0x41   : > { %v1158_v35 = vcombine.low %v855_v13, %v863_v24  ;;  %v1155_v4 = vrot.slane %v1141_v32, %v4658_v26  ;;  %v862_v36 = vrot.slane %v848_v34, %v4658_v26  ;;  %v872_v38 = vcombine.high %v541_v21, %v541_v21  ;;  %v3479_v21 = vld [vmem:[%s5983_s7 + $0x48] sm:$0xff]  ;;  %v3481_v24 = vld [vmem:[%s5983_s7 + $0x58] sm:$0xff]  ;;  %v3482_v32 = vld [vmem:[%s5983_s7 + $0x60] sm:$0xff] }
  0x42   : > { %v1157_v39 = vcombine.low %v845_v23, %v847_v27  ;;  %v1175_v41 = vcombine.low %v4441_v20, %v879_v17  ;;  %v887_v44 = vcombine.high %v879_v17, %v879_v17  ;;  %v896_v48 = vrot.slane %v542_v37, %v4658_v26  ;;  %v3478_v20 = vld [vmem:[%s5983_s7 + $0x40] sm:$0xff]  ;;  %v3480_v23 = vld [vmem:[%s5983_s7 + $0x50] sm:$0xff] }
  0x43   : > { %4078 = vmatmul.mubr.f32.gmra.mrb[8].mxu0 %v1088_v54  ;;  %4300 = vmatpush3.bf16.msra.mxu1 %v4671_v28  ;;  %v1172_v40 = vrot.slane %v1158_v35, %v4658_v26  ;;  %v1156_v42 = vcombine.low %v1148_v33, %v1155_v4  ;;  %v864_v11 = vcombine.high %v862_v36, %v862_v36  ;;  %v3483_v33 = vld [vmem:[%s5983_s7 + $0x68] sm:$0xff]  ;;  %v3484_v27 = vld [vmem:[%s5983_s7 + $0x70] sm:$0xff]  ;;  %v3485_v35 = vld [vmem:[%s5983_s7 + $0x78] sm:$0xff]  ;;  %v4487_v4 = vmov 269488144  }
  0x44   : > { %4080 = vmatprep.mubr.f32.mxu0 %v1105_v60  ;;  %4301 = vmatprep.subr.bf16.mxu1 %v4483_v6  ;;  %v886_v28 = vrot.slane %v872_v38, %v4658_v26  ;;  %v1165_v45 = vrot.slane %v1157_v39, %v4658_v26  ;;  %v1189_v46 = vrot.slane %v1175_v41, %v4658_v26  ;;  %v4489_v39 = vmov 1414812756  }
  0x45   : > { %v889_v50 = vcombine.high %v542_v37, %v542_v37  ;;  %v1174_v51 = vcombine.low %v862_v36, %v864_v11  ;;  %v904_v53 = vcombine.high %v896_v48, %v896_v48  ;;  %v4314_v8 = vpack.c.bf16 %v3473_v15, %v3472_v5 }
  0x46   : > { %v888_v43 = vcombine.high %v886_v28, %v886_v28  ;;  %v1191_v7 = vcombine.low %v887_v44, %v886_v28  ;;  %v1173_v52 = vcombine.low %v1165_v45, %v1172_v40  ;;  %v4318_v13 = vpack.c.bf16 %v3475_v10, %v3474_v9 }
  0x47   : > { %4081 = vmatmul.mubr.f32.gmra.mrb[10].mxu0 %v1122_v22  ;;  %4303 = vmatpush3.bf16.msra.mxu1 %v4673_v29  ;;  %v903_v47 = vrot.slane %v889_v50, %v4658_v26  ;;  %v1182_v54 = vrot.slane %v1174_v51, %v4658_v26  ;;  %v4322_v18 = vpack.c.bf16 %v3477_v16, %v3476_v14  ;;  %v1988_v36 = vunpack.c.l.s4 %v4487_v4 }
  0x48   : > { %4083 = vmatprep.mubr.f32.mxu0 %v1139_v25  ;;  %4304 = vmatprep.subr.bf16.mxu1 %v4483_v6  ;;  %v1192_v55 = vcombine.low %v888_v43, %v896_v48  ;;  %v1199_v56 = vrot.slane %v1191_v7, %v4658_v26  ;;  %v4326_v22 = vpack.c.bf16 %v3479_v21, %v3478_v20  ;;  %v4488_v37 = vmov 842150450  }
  0x49   : > { %v905_v57 = vcombine.high %v903_v47, %v903_v47  ;;  %v1208_v58 = vcombine.low %v904_v53, %v903_v47  ;;  %v1190_v29 = vcombine.low %v1182_v54, %v1189_v46  ;;  %v4330_v25 = vpack.c.bf16 %v3481_v24, %v3480_v23 }
  0x4a   : > { %v1206_v59 = vrot.slane %v1192_v55, %v4658_v26  ;;  %v4334_v34 = vpack.c.bf16 %v3483_v33, %v3482_v32  ;;  %v4338_v17 = vpack.c.bf16 %v3485_v35, %v3484_v27  ;;  %v1995_v38 = vunpack.c.l.s4 %v4488_v37 }
  0x4b   : > { %4084 = vmatmul.mubr.f32.gmra.mrb[12].mxu0 %v1156_v42  ;;  %4306 = vmatpush3.bf16.msra.mxu1 %v4675_v30  ;;  %v1209_v60 = vcombine.low %v905_v57, %v4442_v49  ;;  %v1216_v62 = vrot.slane %v1208_v58, %v4658_v26  ;;  %v2002_v40 = vunpack.c.l.s4 %v4489_v39  ;;  %v4490_v41 = vmov 1987475062  }
  0x4c   : > { %4086 = vmatprep.mubr.f32.mxu0 %v1173_v52  ;;  %4307 = vmatprep.subr.bf16.mxu1 %v4483_v6  ;;  %v1207_v63 = vcombine.low %v1199_v56, %v1206_v59  ;;  %v1900_v6 = vld [vmem:[%s485_s19 + $0x10] sm:$0x3]  ;;  %v2009_v42 = vunpack.c.l.s4 %v4490_v41  ;;  %v1989_v11 = vunpack.c.0.s8 %v1988_v36  ;;  %v1996_v28 = vunpack.c.0.s8 %v1995_v38 }
  0x4d   : > { %v1223_v0 = vrot.slane %v1209_v60, %v4658_v26  ;;  %v2003_v44 = vunpack.c.0.s8 %v2002_v40  ;;  %v504_v46 = vadd.s32 16, %v4608_v12  ;;  %v4935_v51 = vsel %vm505_vm1, 1.0, %v4486_v19 }
  0x4e   : > { %v2010_v45 = vunpack.c.0.s8 %v2009_v42  ;;  %v1992_v48 = vsub.s32 %v1989_v11, %v4608_v12  ;;  %v1999_v49 = vsub.s32 %v1996_v28, %v4608_v12  ;;  %v4491_v7 = vmov 1.0  }
  0x4f   : > { %4087 = vmatmul.mubr.f32.gmra.mrb[14].mxu0 %v1190_v29  ;;  %4309 = vmatpush3.bf16.msra.mxu1 %v4677_v31  ;;  %v1224_v30 = vcombine.low %v1216_v62, %v1223_v0  ;;  %v3471_v31 = vld [vmem:[%s5983_s7 + $0x8] sm:$0xff]  ;;  %v2006_v50 = vsub.s32 %v2003_v44, %v4608_v12  ;;  %vm510_vm2 = vcmp.le.s32.totalorder %v504_v46, 16  ;;  %v2687_v56 = vsub.s32 1, %v4608_v12  ;;  %v4959_v29 = vld [vmem:[%s5980_s4] ss:$0 sm:$0xff] }
  0x50   : > { %4089 = vmatprep.mubr.f32.mxu0 %v1207_v63  ;;  %v4310_v61 = vpack.c.bf16 %v3471_v31, %v3470_v3  ;;  %v2013_v43 = vsub.s32 %v2010_v45, %v4608_v12  ;;  %v4940_v52 = vrot.slane %v4491_v7, %v1992_v48  ;;  %v4942_v47 = vrot.slane %v4491_v7, %v1999_v49  ;;  %v2575_v62 = vld [vmem:[%s5981_s5] sm:$0xff] }
  0x51   : > { %v4944_v53 = vrot.slane %v4491_v7, %v2006_v50  ;;  %v4947_v54 = vrot.slane %v4935_v51, %v1992_v48  ;;  %v4951_v55 = vsel %vm510_vm2, 1.0, %v4486_v19  ;;  %v2812_v57 = vsub.s32 4, %v4608_v12 }
  0x52   : > { %4166 = vmatmul.mubr.f32.vlgmr.msra.gmra.mrb[6].mxu1 %v1898_v1  ;;  %4311 = vmatprep.subr.bf16.mxu0 %v4310_v61  ;;  %6003 = vst [vmem:[#allocation3_spill] sm:$0xff] %v4951_v55  ;;  %v3060_v58 = vsub.s32 2, %v4608_v12  ;;  %v4961_v59 = vrot.slane %v4491_v7, %v2013_v43  ;;  %v4964_v60 = vrot.slane %v4935_v51, %v1999_v49  ;;  %v3185_v63 = vsub.s32 5, %v4608_v12 }
  0x53   : > { %4090 = vmatmul.mubr.f32.gmra.mrb[16].mxu0 %v1224_v30  ;;  %4168 = vmatprep.mubr.msk.f32.mxu1 %vm4485_vm0, %v4486_v19  ;;  %v2136_v1 = vstv %s4938_s20  ;;  %v2579_v30 = vsub.s32 0, %v4608_v12  ;;  %v4978_v31 = vrot.slane %v4935_v51, %v2013_v43  ;;  %v4992_v14 = vrot.slane %v2575_v62, %v2812_v57 }
  0x54   : > { %4313 = vmatpush3.bf16.msra.mxu0 %v4310_v61  ;;  %v4981_v61 = vrot.slane %v4951_v55, %v1992_v48  ;;  %v4994_v16 = vrot.slane %v2575_v62, %v3060_v58  ;;  %v4997_v20 = vrot.slane %v2575_v62, %v3185_v63  ;;  %vm4999_vm3 = vcmp.eq.s32.totalorder %v2136_v1, 1 }
  0x55   : > { %4315 = vmatprep.subr.bf16.mxu0 %v4314_v8  ;;  %6004 = vst [vmem:[#allocation4_spill] sm:$0xff] %v4992_v14  ;;  %v5003_v23 = vrot.slane %v2575_v62, %v2579_v30 }
  0x56   : > { %4169 = vmatmul.mubr.f32.gmra.mrb[8].mxu1 %v1899_v2  ;;  %v2615_v2 = vsub.s32 3, %v4608_v12 }
  0x57   : > { %4171 = vmatprep.mubr.msk.f32.mxu1 %vm4485_vm0, %v4486_v19  ;;  %v4967_v19 = vrot.slane %v4935_v51, %v2006_v50 }
  0x58   : > { %4317 = vmatpush3.bf16.msra.mxu0 %v4314_v8  ;;  %v2936_v8 = vsub.s32 7, %v4608_v12  ;;  %v5005_v24 = vrot.slane %v2575_v62, %v2615_v2 }
  0x59   : > { %4319 = vmatprep.subr.bf16.mxu0 %v4318_v13 }
  0x5a   : > { %4172 = vmatmul.mubr.f32.gmra.mrb[10].mxu1 %v1900_v6  ;;  %v2651_v6 = vsub.s32 6, %v4608_v12  ;;  %6007 = vst [vmem:[#allocation5_spill] sm:$0xff] %v5005_v24 }
  0x5c   : > { %4321 = vmatpush3.bf16.msra.mxu0 %v4318_v13  ;;  %v4990_v13 = vrot.slane %v2575_v62, %v2687_v56 }
  0x5d   : > { %4323 = vmatprep.subr.bf16.mxu0 %v4322_v18 }
  0x60   : > { %4325 = vmatpush3.bf16.msra.mxu0 %v4322_v18 }
  0x61   : > { %4327 = vmatprep.subr.bf16.mxu0 %v4326_v22 }
  0x64   : > { %4329 = vmatpush3.bf16.msra.mxu0 %v4326_v22 }
  0x65   : > { %4331 = vmatprep.subr.bf16.mxu0 %v4330_v25 }
  0x68   : > { %4333 = vmatpush3.bf16.msra.mxu0 %v4330_v25  ;;  %v5007_v25 = vrot.slane %v2575_v62, %v2651_v6 }
  0x69   : > { %4335 = vmatprep.subr.bf16.mxu0 %v4334_v34 }
  0x6c   : > { %4337 = vmatpush3.bf16.msra.mxu0 %v4334_v34 }
  0x6d   : > { %4339 = vmatprep.subr.bf16.mxu0 %v4338_v17 }
  0x70   : > { %4341 = vmatpush3.bf16.msra.mxu0 %v4338_v17  ;;  %v5010_v17 = vrot.slane %v2575_v62, %v2936_v8 }
 0x105   : > { %v1881_v0 = vpop.f32.mrb[0].mxu1 }
 0x106   : > { %v4067_v3 = vpop.f32.mrb[0].mxu0  ;;  %v1882_v5 = vadd.f32 %v4959_v29, %v1881_v0  ;;  %v4126_v15 = vpop.f32.mrb[1].mxu1 }
 0x107   : > { %v1315_v9 = vadd.f32 %v4067_v3, %v4959_v29  ;;  %v1309_v10 = vpop.f32.mrb[1].mxu0 }
 0x108   : > { %v1310_v18 = vadd.f32 %v4959_v29, %v1309_v10  ;;  %v1895_v21 = vmax.f32 %v1882_v5, 0.0 }
 0x109   : > { %v1399_v22 = vmax.f32 %v1315_v9, 0.0  ;;  %v1886_v32 = vpop.f32.mrb[2].mxu1 }
 0x10a   : > { %v1398_v33 = vmax.f32 %v1310_v18, 0.0  ;;  %v4070_v34 = vpop.f32.mrb[2].mxu0  ;;  %v2132_v27 = vmul.f32 %v4935_v51, %v1895_v21  ;;  %v4129_v35 = vpop.f32.mrb[3].mxu1  ;;  %v5016_v40 = vadd.f32 %v4959_v29, %v1886_v32 }
 0x10b   : > { %v1451_v36 = vcombine.high %v1399_v22, %v1399_v22  ;;  %v1458_v37 = vrot.slane %v1399_v22, %v4658_v26  ;;  %v1325_v38 = vadd.f32 %v4070_v34, %v4959_v29  ;;  %v1319_v39 = vpop.f32.mrb[3].mxu0 }
 0x10c   : > { %v1434_v41 = vcombine.high %v1398_v33, %v1398_v33  ;;  %v1441_v42 = vrot.slane %v1398_v33, %v4658_v26  ;;  %v1320_v11 = vadd.f32 %v4959_v29, %v1319_v39  ;;  %v5022_v28 = vsel %vm4999_vm3, %v2132_v27, 0.0 }
 0x10d   : > { %v1465_v44 = vrot.slane %v1451_v36, %v4658_v26  ;;  %v1466_v45 = vcombine.high %v1458_v37, %v1458_v37  ;;  %v2063_v46 = vmul.f32 %v4940_v52, %v1458_v37  ;;  %v1401_v48 = vmax.f32 %v1325_v38, 0.0  ;;  %v5026_v49 = vpop.f32.mrb[4].mxu1 }
 0x10e   : > { %v1448_v50 = vrot.slane %v1434_v41, %v4658_v26  ;;  %v1449_v43 = vcombine.high %v1441_v42, %v1441_v42  ;;  %v2059_v7 = vmul.f32 %v4947_v54, %v1441_v42  ;;  %v1400_v56 = vmax.f32 %v1320_v11, 0.0  ;;  %v4073_v57 = vpop.f32.mrb[4].mxu0  ;;  %v4132_v58 = vpop.f32.mrb[5].mxu1 }
 0x10f   : > { %v1467_v62 = vcombine.high %v1465_v44, %v1465_v44  ;;  %v2064_v63 = vmul.f32 %v4942_v47, %v1466_v45  ;;  %v2065_v0 = vmul.f32 %v4944_v53, %v1465_v44  ;;  %v1485_v1 = vcombine.high %v1401_v48, %v1401_v48  ;;  %v1329_v30 = vpop.f32.mrb[5].mxu0 }
 0x110   : > { %v1450_v2 = vcombine.high %v1448_v50, %v1448_v50  ;;  %v2060_v6 = vmul.f32 %v4964_v60, %v1449_v43  ;;  %v2061_v3 = vmul.f32 %v4967_v19, %v1448_v50  ;;  %v1492_v5 = vrot.slane %v1401_v48, %v4658_v26 }
 0x111   : > { %v2066_v15 = vmul.f32 %v4961_v59, %v1467_v62  ;;  %v2240_v8 = vcombine.low %v2063_v46, %v2064_v63  ;;  %v5037_v9 = vrot.slane %v1485_v1, %v4658_v26  ;;  %v1468_v10 = vcombine.high %v1400_v56, %v1400_v56 }
 0x112   : > { %v2062_v18 = vmul.f32 %v4978_v31, %v1450_v2  ;;  %v2223_v21 = vcombine.low %v2059_v7, %v2060_v6  ;;  %v1500_v22 = vcombine.high %v1492_v5, %v1492_v5  ;;  %v2071_v32 = vmul.f32 %v4978_v31, %v1492_v5  ;;  %v5041_v33 = vpop.f32.mrb[6].mxu0 }
 0x113   : > { %v2241_v34 = vcombine.low %v2065_v0, %v2066_v15  ;;  %v2248_v27 = vrot.slane %v2240_v8, %v4658_v26  ;;  %v1501_v35 = vcombine.high %v5037_v9, %v5037_v9  ;;  %v2073_v36 = vmul.f32 %v4942_v47, %v5037_v9  ;;  %v5048_v37 = vpop.f32.mrb[7].mxu0 }
 0x114   : > { %v2224_v38 = vcombine.low %v2061_v3, %v2062_v18  ;;  %v2231_v39 = vrot.slane %v2223_v21, %v4658_v26  ;;  %v2072_v41 = vmul.f32 %v4940_v52, %v1500_v22  ;;  %v1475_v42 = vrot.slane %v1400_v56, %v4658_v26 }
 0x115   : > { %v2255_v11 = vrot.slane %v2241_v34, %v4658_v26  ;;  %v1482_v44 = vrot.slane %v1468_v10, %v4658_v26  ;;  %v1335_v45 = vadd.f32 %v4073_v57, %v4959_v29  ;;  %v1330_v46 = vadd.f32 %v4959_v29, %v1329_v30 }
 0x116   : > { %v2238_v48 = vrot.slane %v2224_v38, %v4658_v26  ;;  %v2281_v50 = vcombine.low %v2072_v41, %v2073_v36  ;;  %v1483_v43 = vcombine.high %v1475_v42, %v1475_v42  ;;  %v2067_v7 = vmul.f32 %v4981_v61, %v1475_v42  ;;  %v5059_v58 = vpop.f32.mrb[8].mxu0 }
 0x117   : > { %v5061_v62 = vcombine.low %v2248_v27, %v2255_v11  ;;  %v1484_v63 = vcombine.high %v1482_v44, %v1482_v44  ;;  %v2069_v56 = vmul.f32 %v4964_v60, %v1482_v44  ;;  %v1403_v0 = vmax.f32 %v1335_v45, 0.0  ;;  %v5064_v1 = vpop.f32.mrb[9].mxu0 }
 0x118   : > { %v5066_v2 = vcombine.low %v2231_v39, %v2238_v48  ;;  %v5069_v57 = vrot.slane %v2281_v50, %v4658_v26  ;;  %v2068_v30 = vmul.f32 %v4947_v54, %v1483_v43  ;;  %v2263_v6 = vrot.slane %v2067_v7, %v4658_v26 }
 0x119   : > { %v2070_v3 = vmul.f32 %v4967_v19, %v1484_v63  ;;  %v1519_v5 = vcombine.high %v1403_v0, %v1403_v0  ;;  %v1526_v15 = vrot.slane %v1403_v0, %v4658_v26  ;;  %v1402_v8 = vmax.f32 %v1330_v46, 0.0 }
 0x11a   : > { %6008 = vst [vmem:[#allocation6_spill] sm:$0xff] %v5066_v2  ;;  %v2264_v9 = vcombine.low %v2068_v30, %v2069_v56  ;;  %v5076_v10 = vmul.f32 %v4990_v13, %v2263_v6  ;;  %v5079_v18 = vmul.f32 %v4992_v14, %v2263_v6  ;;  %v5082_v21 = vmul.f32 %v4994_v16, %v2263_v6  ;;  %v5084_v22 = vpop.f32.mrb[10].mxu0 }
 0x11b   : > { %v2265_v34 = vcombine.low %v2070_v3, %v2071_v32  ;;  %v5087_v27 = vmul.f32 %v4997_v20, %v2263_v6  ;;  %v1533_v36 = vrot.slane %v1519_v5, %v4658_v26  ;;  %v1534_v38 = vcombine.high %v1526_v15, %v1526_v15  ;;  %v5090_v39 = vpop.f32.mrb[11].mxu0 }
 0x11c   : > { %6009 = vst [vmem:[#allocation7_spill] sm:$0xff] %v5076_v10  ;;  %6010 = vst [vmem:[#allocation8_spill] sm:$0xff] %v5082_v21  ;;  %v2272_v41 = vrot.slane %v2264_v9, %v4658_v26  ;;  %v2079_v48 = vmul.f32 %v4967_v19, %v1526_v15  ;;  %v1502_v7 = vcombine.high %v1402_v8, %v1402_v8 }
 0x11d   : > { %v2279_v45 = vrot.slane %v2265_v34, %v4658_v26  ;;  %v1535_v46 = vcombine.high %v1533_v36, %v1533_v36  ;;  %v2080_v50 = vmul.f32 %v4978_v31, %v1534_v38  ;;  %v2081_v43 = vmul.f32 %v4940_v52, %v1533_v36 }
 0x11e   : > { %v1509_v63 = vrot.slane %v1402_v8, %v4658_v26  ;;  %v5102_v56 = vpop.f32.mrb[12].mxu0  ;;  %v2074_v6 = vmul.f32 %v4944_v53, %v1501_v35  ;;  %v2581_v3 = vmul.f32 %v5003_v23, %v5022_v28  ;;  %v1516_v9 = vrot.slane %v1502_v7, %v4658_v26 }
 0x11f   : > { %v5104_v0 = vcombine.low %v2272_v41, %v2279_v45  ;;  %v2082_v30 = vmul.f32 %v4942_v47, %v1535_v46  ;;  %v5110_v5 = vpop.f32.mrb[13].mxu0  ;;  %v2306_v15 = vcombine.low %v2079_v48, %v2080_v50  ;;  %v2617_v38 = vmul.f32 %v5005_v24, %v5066_v2 }
 0x120   : > { %v1517_v34 = vcombine.high %v1509_v63, %v1509_v63  ;;  %v2075_v8 = vmul.f32 %v4961_v59, %v1509_v63  ;;  %v2689_v35 = vmul.f32 %v4990_v13, %v5022_v28  ;;  %v1518_v46 = vcombine.high %v1516_v9, %v1516_v9 }
 0x121   : > { %6011 = vst [vmem:[#allocation9_spill] sm:$0xff] %v5104_v0  ;;  %v2322_v36 = vcombine.low %v2081_v43, %v2082_v30  ;;  %v2653_v41 = vmul.f32 %v5007_v25, %v5104_v0  ;;  %v2320_v45 = vrot.slane %v2306_v15, %v4658_v26  ;;  %v2077_v50 = vmul.f32 %v4947_v54, %v1516_v9 }
 0x122   : > { %v2076_v48 = vmul.f32 %v4981_v61, %v1517_v34  ;;  %v5123_v7 = vpop.f32.mrb[14].mxu0  ;;  %v2282_v63 = vcombine.low %v2074_v6, %v2075_v8  ;;  %v2633_v30 = vadd.f32 %v2617_v38, %v2581_v3  ;;  %v2738_v44 = vrot.slane %v2689_v35, 1 }
 0x123   : > { %v5126_v43 = vrot.slane %v2322_v36, %v4658_v26  ;;  %v5128_v42 = vpop.f32.mrb[15].mxu0  ;;  %v2078_v4 = vmul.f32 %v4964_v60, %v1518_v46  ;;  %v3062_v15 = vmul.f32 %v4994_v16, %v5022_v28  ;;  %v1896_v9 = vmax.f32 %v5016_v40, 0.0 }
 0x124   : > { %v5132_v32 = vrot.slane %v2076_v48, %v4658_v26  ;;  %v2296_v34 = vrot.slane %v2282_v63, %v4658_v26  ;;  %v2669_v11 = vadd.f32 %v2653_v41, %v2633_v30  ;;  %v2618_v6 = vmul.f32 %v5005_v24, %v5061_v62 }
 0x125   : > { %v2814_v3 = vmul.f32 %v4992_v14, %v5066_v2  ;;  %v5142_v8 = vpop.f32.mrb[6].mxu1  ;;  %v2305_v36 = vcombine.low %v2077_v50, %v2078_v4  ;;  %v3111_v38 = vrot.slane %v3062_v15, 2  ;;  %v2139_v35 = vsel %vm4999_vm3, %v1896_v9, 0.0 }
 0x126   : > { %v2815_v28 = vmul.f32 %v4992_v14, %v5061_v62  ;;  %v5148_v40 = vpop.f32.mrb[16].mxu0  ;;  %v4167_v46 = vpop.f32.mrb[7].mxu1  ;;  %v5151_v41 = vcombine.low %v5069_v57, %v2296_v34  ;;  %v2582_v48 = vmul.f32 %v5003_v23, %v2139_v35  ;;  %v5155_v63 = vmul.f32 %v4990_v13, %v2139_v35 }
 0x127   : > { %v2862_v30 = vrot.slane %v2814_v3, 1  ;;  %v5157_v4 = vpop.f32.mrb[17].mxu0  ;;  %v2313_v50 = vrot.slane %v2305_v36, %v4658_v26  ;;  %v5161_v9 = vmul.f32 %v4994_v16, %v2139_v35  ;;  %v1345_v46 = vadd.f32 %v5041_v33, %v4959_v29 }
 0x128   : > { %v2863_v15 = vrot.slane %v2815_v28, 1  ;;  %v2634_v21 = vadd.f32 %v2618_v6, %v2582_v48  ;;  %v2654_v57 = vmul.f32 %v5007_v25, %v5151_v41  ;;  %v2739_v34 = vrot.slane %v5155_v63, 1 }
 0x129   : > { %v1340_v3 = vadd.f32 %v4959_v29, %v5048_v37  ;;  %v5170_v10 = vpop.f32.mrb[8].mxu1  ;;  %v5172_v2 = vcombine.low %v2313_v50, %v2320_v45  ;;  %v3112_v35 = vrot.slane %v5161_v9, 2  ;;  %v1405_v28 = vmax.f32 %v1345_v46, 0.0 }
 0x12a   : > { %v2864_v36 = vsel %vm2737_vm4, %v2862_v30, %v2863_v15  ;;  %v4170_v0 = vpop.f32.mrb[9].mxu1  ;;  %v2670_v33 = vadd.f32 %v2654_v57, %v2634_v21  ;;  %v2740_v6 = vsel %vm2737_vm4, %v2738_v44, %v2739_v34  ;;  %v1892_v63 = vadd.f32 %v4959_v29, %v5026_v49 }
 0x12b   : > { %6012 = vst [vmem:[#allocation10_spill] sm:$0xff] %v5172_v2  ;;  %v1404_v48 = vmax.f32 %v1340_v3, 0.0  ;;  %v2794_v14 = vadd.f32 %v2740_v6, %v2669_v11  ;;  %v5180_v37 = vsel %vm3110_vm5, %v3111_v38, %v3112_v35  ;;  %v1553_v24 = vcombine.high %v1405_v28, %v1405_v28 }
 0x12c   : > { %v1560_v45 = vrot.slane %v1405_v28, %v4658_v26  ;;  %v1897_v9 = vmax.f32 %v1892_v63, 0.0  ;;  %v6013_v0 = vrot.slane %v5079_v18, 1 }
 0x12d   : > { %v1536_v50 = vcombine.high %v1404_v48, %v1404_v48  ;;  %v1543_v30 = vrot.slane %v1404_v48, %v4658_v26  ;;  %v5187_v44 = vpop.f32.mrb[10].mxu1  ;;  %v5189_v46 = vadd.f32 %v2864_v36, %v2794_v14  ;;  %v1567_v49 = vrot.slane %v1553_v24, %v4658_v26 }
 0x12e   : > { %v2866_v21 = vsel %vm2737_vm4, %v2863_v15, %v6013_v0  ;;  %v1568_v11 = vcombine.high %v1560_v45, %v1560_v45  ;;  %v2087_v38 = vmul.f32 %v4964_v60, %v1560_v45  ;;  %v4173_v57 = vpop.f32.mrb[11].mxu1  ;;  %v2134_v48 = vmul.f32 %v4951_v55, %v1897_v9 }
 0x12f   : > { %v1550_v3 = vrot.slane %v1536_v50, %v4658_v26  ;;  %v1551_v28 = vcombine.high %v1543_v30, %v1543_v30  ;;  %v2083_v6 = vmul.f32 %v4944_v53, %v1543_v30  ;;  %v1569_v18 = vcombine.high %v1567_v49, %v1567_v49 }
 0x130   : > { %v2088_v15 = vmul.f32 %v4967_v19, %v1568_v11  ;;  %v2089_v63 = vmul.f32 %v4978_v31, %v1567_v49  ;;  %v5200_v14 = vmul.f32 %v5010_v17, %v5151_v41  ;;  %v2140_v50 = vsel %vm4999_vm3, %v2134_v48, 0.0 }
 0x131   : > { %v1552_v24 = vcombine.high %v1550_v3, %v1550_v3  ;;  %v2084_v36 = vmul.f32 %v4961_v59, %v1551_v28  ;;  %v2085_v45 = vmul.f32 %v4981_v61, %v1550_v3  ;;  %v2691_v9 = vmul.f32 %v4990_v13, %v2140_v50 }
 0x132   : > { %v2347_v30 = vcombine.low %v2088_v15, %v2089_v63  ;;  %v2940_v0 = vmul.f32 %v5010_v17, %v5132_v32  ;;  %v3064_v28 = vmul.f32 %v4994_v16, %v2140_v50  ;;  %v5218_v15 = vmul.f32 %v4997_v20, %v5061_v62 }
 0x133   : > { %v2086_v11 = vmul.f32 %v4947_v54, %v1552_v24  ;;  %v2323_v57 = vcombine.low %v2083_v6, %v2084_v36  ;;  %v5212_v55 = vrot.slane %v2085_v45, %v4658_v26  ;;  %v2741_v12 = vrot.slane %v2691_v9, 1 }
 0x134   : > { %v2361_v3 = vrot.slane %v2347_v30, %v4658_v26  ;;  %v2989_v48 = vrot.slane %v2940_v0, 1  ;;  %v3114_v49 = vrot.slane %v3064_v28, 2  ;;  %v1355_v6 = vadd.f32 %v5059_v58, %v4959_v29 }
 0x135   : > { %v2337_v63 = vrot.slane %v2323_v57, %v4658_v26  ;;  %v2346_v2 = vcombine.low %v2086_v11, %v2087_v38  ;;  %v2742_v24 = vsel %vm2737_vm4, %v2739_v34, %v2741_v12  ;;  %v6014_v36 = vrot.slane %v5200_v14, 1 }
 0x136   : > { %v5998_v50 = vrot.slane %v5218_v15, 2  ;;  %v1350_v30 = vadd.f32 %v4959_v29, %v5064_v1  ;;  %v2795_v0 = vadd.f32 %v2742_v24, %v2670_v33  ;;  %v3115_v11 = vsel %vm3110_vm5, %v3112_v35, %v3114_v49 }
 0x137   : > { %v2990_v45 = vsel %vm2737_vm4, %v6014_v36, %v2989_v48  ;;  %v5231_v9 = vcombine.low %v5126_v43, %v2337_v63  ;;  %v2354_v38 = vrot.slane %v2346_v2, %v4658_v26  ;;  %v6015_v58 = vrot.slane %v5087_v27, 2 }
 0x138   : > { %v1407_v57 = vmax.f32 %v1355_v6, 0.0  ;;  %v1406_v28 = vmax.f32 %v1350_v30, 0.0  ;;  %v2090_v12 = vmul.f32 %v4940_v52, %v1569_v18  ;;  %v2919_v1 = vadd.f32 %v2866_v21, %v2795_v0 }
 0x139   : > { %v3239_v34 = vsel %vm3110_vm5, %v5998_v50, %v6015_v58  ;;  %v5241_v48 = vcombine.low %v2354_v38, %v2361_v3  ;;  %v1365_v43 = vadd.f32 %v5084_v22, %v4959_v29  ;;  %v1360_v2 = vadd.f32 %v4959_v29, %v5090_v39 }
 0x13a   : > { %v1587_v35 = vcombine.high %v1407_v57, %v1407_v57  ;;  %v1594_v27 = vrot.slane %v1407_v57, %v4658_v26  ;;  %v1570_v33 = vcombine.high %v1406_v28, %v1406_v28  ;;  %v1577_v49 = vrot.slane %v1406_v28, %v4658_v26 }
 0x13b   : > { %v3043_v63 = vadd.f32 %v2990_v45, %v2919_v1  ;;  %v1409_v6 = vmax.f32 %v1365_v43, 0.0  ;;  %v1408_v24 = vmax.f32 %v1360_v2, 0.0  ;;  %v1375_v18 = vadd.f32 %v5102_v56, %v4959_v29 }
 0x13c   : > { %v1601_v21 = vrot.slane %v1587_v35, %v4658_v26  ;;  %v1602_v3 = vcombine.high %v1594_v27, %v1594_v27  ;;  %v2095_v22 = vmul.f32 %v4947_v54, %v1594_v27  ;;  %v1584_v36 = vrot.slane %v1570_v33, %v4658_v26 }
 0x13d   : > { %v3168_v39 = vadd.f32 %v3115_v11, %v3043_v63  ;;  %v1585_v30 = vcombine.high %v1577_v49, %v1577_v49  ;;  %v2091_v38 = vmul.f32 %v4942_v47, %v1577_v49  ;;  %v1621_v0 = vcombine.high %v1409_v6, %v1409_v6 }
 0x13e   : > { %v1603_v58 = vcombine.high %v1601_v21, %v1601_v21  ;;  %v2096_v45 = vmul.f32 %v4964_v60, %v1602_v3  ;;  %v2097_v57 = vmul.f32 %v4967_v19, %v1601_v21  ;;  %v1586_v28 = vcombine.high %v1584_v36, %v1584_v36 }
 0x13f   : > { %v5257_v1 = vadd.f32 %v3239_v34, %v3168_v39  ;;  %v2092_v56 = vmul.f32 %v4944_v53, %v1585_v30  ;;  %v2093_v43 = vmul.f32 %v4961_v59, %v1584_v36  ;;  %v2363_v2 = vcombine.low %v2090_v12, %v2091_v38 }
 0x140   : > { %v2098_v35 = vmul.f32 %v4978_v31, %v1603_v58  ;;  %v2387_v11 = vcombine.low %v2095_v22, %v2096_v45  ;;  %v2094_v27 = vmul.f32 %v4981_v61, %v1586_v28  ;;  %v1628_v33 = vrot.slane %v1409_v6, %v4658_v26 }
 0x141   : > { %v2364_v49 = vcombine.low %v2092_v56, %v2093_v43  ;;  %v2371_v63 = vrot.slane %v2363_v2, %v4658_v26  ;;  %v1635_v21 = vrot.slane %v1621_v0, %v4658_v26  ;;  %v1604_v3 = vcombine.high %v1408_v24, %v1408_v24 }
 0x142   : > { %v2388_v34 = vcombine.low %v2097_v57, %v2098_v35  ;;  %v2395_v39 = vrot.slane %v2387_v11, %v4658_v26  ;;  %v5268_v30 = vrot.slane %v2094_v27, %v4658_v26  ;;  %v1636_v12 = vcombine.high %v1628_v33, %v1628_v33 }
 0x143   : > { %v2378_v36 = vrot.slane %v2364_v49, %v4658_v26  ;;  %v1637_v22 = vcombine.high %v1635_v21, %v1635_v21  ;;  %v2103_v38 = vmul.f32 %v4981_v61, %v1628_v33  ;;  %v2105_v6 = vmul.f32 %v4964_v60, %v1635_v21 }
 0x144   : > { %v2402_v58 = vrot.slane %v2388_v34, %v4658_v26  ;;  %v2104_v45 = vmul.f32 %v4947_v54, %v1636_v12  ;;  %v1611_v0 = vrot.slane %v1408_v24, %v4658_v26  ;;  %v1618_v57 = vrot.slane %v1604_v3, %v4658_v26 }
 0x145   : > { %v5277_v28 = vcombine.low %v2371_v63, %v2378_v36  ;;  %v5280_v56 = vrot.slane %v2103_v38, %v4658_v26  ;;  %v1411_v43 = vmax.f32 %v1375_v18, 0.0  ;;  %v1370_v2 = vadd.f32 %v4959_v29, %v5110_v5 }
 0x146   : > { %v5284_v35 = vcombine.low %v2395_v39, %v2402_v58  ;;  %v2428_v11 = vcombine.low %v2104_v45, %v2105_v6  ;;  %v1619_v27 = vcombine.high %v1611_v0, %v1611_v0  ;;  %v1620_v33 = vcombine.high %v1618_v57, %v1618_v57 }
 0x147   : > { %v2099_v49 = vmul.f32 %v4940_v52, %v1611_v0  ;;  %v2101_v24 = vmul.f32 %v4944_v53, %v1618_v57  ;;  %v1655_v21 = vcombine.high %v1411_v43, %v1411_v43  ;;  %v1662_v63 = vrot.slane %v1411_v43, %v4658_v26 }
 0x148   : > { %v2436_v3 = vrot.slane %v2428_v11, %v4658_v26  ;;  %v2100_v34 = vmul.f32 %v4942_v47, %v1619_v27  ;;  %v2102_v18 = vmul.f32 %v4961_v59, %v1620_v33  ;;  %v1410_v12 = vmax.f32 %v1370_v2, 0.0 }
 0x149   : > { %v1669_v5 = vrot.slane %v1655_v21, %v4658_v26  ;;  %v1670_v39 = vcombine.high %v1662_v63, %v1662_v63  ;;  %v2111_v36 = vmul.f32 %v4961_v59, %v1662_v63  ;;  %v2106_v38 = vmul.f32 %v4967_v19, %v1637_v22 }
 0x14a   : > { %v2404_v6 = vcombine.low %v2099_v49, %v2100_v34  ;;  %v2405_v58 = vcombine.low %v2101_v24, %v2102_v18  ;;  %v1638_v45 = vcombine.high %v1410_v12, %v1410_v12  ;;  %v1645_v0 = vrot.slane %v1410_v12, %v4658_v26 }
 0x14b   : > { %v1671_v57 = vcombine.high %v1669_v5, %v1669_v5  ;;  %v2112_v43 = vmul.f32 %v4981_v61, %v1670_v39  ;;  %v2113_v11 = vmul.f32 %v4947_v54, %v1669_v5  ;;  %v1385_v2 = vadd.f32 %v5123_v7, %v4959_v29 }
 0x14c   : > { %v2412_v27 = vrot.slane %v2404_v6, %v4658_v26  ;;  %v2419_v33 = vrot.slane %v2405_v58, %v4658_v26  ;;  %v1652_v21 = vrot.slane %v1638_v45, %v4658_v26  ;;  %v1653_v22 = vcombine.high %v1645_v0, %v1645_v0 }
 0x14d   : > { %v2114_v49 = vmul.f32 %v4964_v60, %v1671_v57  ;;  %v5305_v24 = vrot.slane %v2112_v43, %v4658_v26  ;;  %v2107_v63 = vmul.f32 %v4978_v31, %v1645_v0  ;;  %v1413_v34 = vmax.f32 %v1385_v2, 0.0 }
 0x14e   : > { %v5308_v18 = vcombine.low %v2412_v27, %v2419_v33  ;;  %v1654_v12 = vcombine.high %v1652_v21, %v1652_v21  ;;  %v2108_v7 = vmul.f32 %v4940_v52, %v1653_v22  ;;  %v2109_v5 = vmul.f32 %v4942_v47, %v1652_v21 }
 0x14f   : > { %6016 = vst [vmem:[#allocation11_spill] sm:$0xff] %v5305_v24  ;;  %v2469_v39 = vcombine.low %v2113_v11, %v2114_v49  ;;  %v2429_v6 = vcombine.low %v2106_v38, %v2107_v63  ;;  %v1689_v58 = vcombine.high %v1413_v34, %v1413_v34  ;;  %v1696_v45 = vrot.slane %v1413_v34, %v4658_v26 }
 0x150   : > { %v2110_v57 = vmul.f32 %v4944_v53, %v1654_v12  ;;  %v2445_v50 = vcombine.low %v2108_v7, %v2109_v5  ;;  %v1380_v43 = vadd.f32 %v4959_v29, %v5128_v42  ;;  %v1395_v0 = vadd.f32 %v5148_v40, %v4959_v29 }
 0x151   : > { %v2477_v2 = vrot.slane %v2469_v39, %v4658_v26  ;;  %v2443_v27 = vrot.slane %v2429_v6, %v4658_v26  ;;  %v1703_v33 = vrot.slane %v1689_v58, %v4658_v26  ;;  %v1704_v11 = vcombine.high %v1696_v45, %v1696_v45 }
 0x152   : > { %v2446_v38 = vcombine.low %v2110_v57, %v2111_v36  ;;  %v2453_v21 = vrot.slane %v2445_v50, %v4658_v26  ;;  %v2119_v22 = vmul.f32 %v4944_v53, %v1696_v45  ;;  %v1412_v49 = vmax.f32 %v1380_v43, 0.0 }
 0x153   : > { %v5323_v63 = vcombine.low %v2436_v3, %v2443_v27  ;;  %v1705_v42 = vcombine.high %v1703_v33, %v1703_v33  ;;  %v2120_v34 = vmul.f32 %v4961_v59, %v1704_v11  ;;  %v2121_v40 = vmul.f32 %v4981_v61, %v1703_v33 }
 0x154   : > { %v2460_v12 = vrot.slane %v2446_v38, %v4658_v26  ;;  %v1672_v7 = vcombine.high %v1412_v49, %v1412_v49  ;;  %v1679_v5 = vrot.slane %v1412_v49, %v4658_v26  ;;  %v1415_v39 = vmax.f32 %v1395_v0, 0.0 }
 0x155   : > { %v2487_v36 = vcombine.low %v2119_v22, %v2120_v34  ;;  %v5330_v50 = vrot.slane %v2121_v40, %v4658_v26  ;;  %v1390_v3 = vadd.f32 %v4959_v29, %v5157_v4  ;;  %v2122_v6 = vmul.f32 %v4947_v54, %v1705_v42 }
 0x156   : > { %v5335_v58 = vcombine.low %v2453_v21, %v2460_v12  ;;  %v1686_v45 = vrot.slane %v1672_v7, %v4658_v26  ;;  %v1687_v57 = vcombine.high %v1679_v5, %v1679_v5  ;;  %v2115_v43 = vmul.f32 %v4967_v19, %v1679_v5 }
 0x157   : > { %v6018_v27 = vstv %s4987_s27  ;;  %v2501_v0 = vrot.slane %v2487_v36, %v4658_v26  ;;  %v1723_v11 = vcombine.high %v1415_v39, %v1415_v39  ;;  %v1730_v38 = vrot.slane %v1415_v39, %v4658_v26 }
 0x158   : > { %6017 = vst [vmem:[#allocation12_spill] sm:$0xff] %v5335_v58  ;;  %vm5341_vm6 = vcmp.eq.s32.totalorder %v6018_v27, 1  ;;  %v1414_v4 = vmax.f32 %v1390_v3, 0.0  ;;  %v1688_v22 = vcombine.high %v1686_v45, %v1686_v45  ;;  %v2116_v54 = vmul.f32 %v4978_v31, %v1687_v57 }
 0x159   : > { %v2117_v21 = vmul.f32 %v4940_v52, %v1686_v45  ;;  %v1968_v49 = vadd.f32 %v4959_v29, %v5142_v8  ;;  %v1737_v42 = vrot.slane %v1723_v11, %v4658_v26  ;;  %v1738_v34 = vcombine.high %v1730_v38, %v1730_v38 }
 0x15a   : > { %v2127_v40 = vmul.f32 %v4942_v47, %v1730_v38  ;;  %v1706_v12 = vcombine.high %v1414_v4, %v1414_v4  ;;  %v2118_v7 = vmul.f32 %v4942_v47, %v1688_v22  ;;  %v2470_v5 = vcombine.low %v2115_v43, %v2116_v54 }
 0x15b   : > { %v1713_v39 = vrot.slane %v1414_v4, %v4658_v26  ;;  %v1981_v36 = vmax.f32 %v1968_v49, 0.0  ;;  %v1739_v3 = vcombine.high %v1737_v42, %v1737_v42  ;;  %v2128_v57 = vmul.f32 %v4944_v53, %v1738_v34 }
 0x15c   : > { %v2129_v45 = vmul.f32 %v4961_v59, %v1737_v42  ;;  %v1720_v27 = vrot.slane %v1706_v12, %v4658_v26  ;;  %v2484_v8 = vrot.slane %v2470_v5, %v4658_v26  ;;  %v2486_v11 = vcombine.low %v2117_v21, %v2118_v7 }
 0x15d   : > { %v1721_v24 = vcombine.high %v1713_v39, %v1713_v39  ;;  %v2123_v38 = vmul.f32 %v4964_v60, %v1713_v39  ;;  %v2130_v58 = vmul.f32 %v4981_v61, %v1739_v3  ;;  %v2142_v61 = vmul.f32 %v4935_v51, %v1981_v36 }
 0x15e   : > { %v2528_v47 = vcombine.low %v2128_v57, %v2129_v45  ;;  %v1722_v43 = vcombine.high %v1720_v27, %v1720_v27  ;;  %v2125_v4 = vmul.f32 %v4978_v31, %v1720_v27  ;;  %v5362_v22 = vcombine.low %v2477_v2, %v2484_v8 }
 0x15f   : > { %v2494_v53 = vrot.slane %v2486_v11, %v4658_v26  ;;  %v2124_v59 = vmul.f32 %v4967_v19, %v1721_v24  ;;  %v2510_v54 = vcombine.low %v2122_v6, %v2123_v38  ;;  %v5368_v21 = vrot.slane %v2130_v58, %v4658_v26  ;;  %v5387_v6 = vld [vmem:[%s5981_s5 + $0x8] ss:$0 sm:$0xff]  ;;  %v6021_v38 = vld [vmem:[#allocation5_spill] sm:$0xff] }
 0x160   : > { %v2542_v49 = vrot.slane %v2528_v47, %v4658_v26  ;;  %v2126_v60 = vmul.f32 %v4940_v52, %v1722_v43  ;;  %v2595_v2 = vmul.f32 %v5003_v23, %v5362_v22  ;;  %v2148_v19 = vsel %vm5341_vm6, %v2142_v61, 0.0 }
 0x161   : > { %v5372_v42 = vcombine.low %v2494_v53, %v2501_v0  ;;  %v2511_v34 = vcombine.low %v2124_v59, %v2125_v4  ;;  %v2518_v31 = vrot.slane %v2510_v54, %v4658_v26  ;;  %v2710_v24 = vmul.f32 %v4990_v13, %v5362_v22  ;;  %v6022_v53 = vld [vmem:[#allocation4_spill] sm:$0xff] }
 0x162   : > { %v2527_v12 = vcombine.low %v2126_v60, %v2127_v40  ;;  %v1973_v52 = vadd.f32 %v4959_v29, %v5170_v10  ;;  %v2667_v58 = vmul.f32 %v5007_v25, %v2148_v19  ;;  %v2959_v40 = vmul.f32 %v5010_v17, %v2148_v19 }
 0x163   : > { %v2525_v51 = vrot.slane %v2511_v34, %v4658_v26  ;;  %v2711_v0 = vmul.f32 %v4990_v13, %v5372_v42  ;;  %v2773_v5 = vrot.slane %v2710_v24, 1  ;;  %v5395_v39 = vmul.f32 %v5387_v6, %v2148_v19 }
 0x164   : > { %v2535_v7 = vrot.slane %v2527_v12, %v4658_v26  ;;  %v1982_v10 = vmax.f32 %v1973_v52, 0.0  ;;  %v3021_v57 = vrot.slane %v2959_v40, 1  ;;  %v2596_v45 = vmul.f32 %v5003_v23, %v5372_v42 }
 0x165   : > { %v5397_v36 = vcombine.low %v2518_v31, %v2525_v51  ;;  %v2774_v3 = vrot.slane %v2711_v0, 1  ;;  %v3394_v8 = vrot.slane %v5395_v39, 2  ;;  %v2712_v26 = vmul.f32 %v4990_v13, %v5330_v50 }
 0x166   : > { %v5401_v27 = vcombine.low %v2535_v7, %v2542_v49  ;;  %v2149_v11 = vsel %vm5341_vm6, %v1982_v10, 0.0  ;;  %v2837_v61 = vmul.f32 %v6022_v53, %v5368_v21  ;;  %v6023_v10 = vld [vmem:[#allocation9_spill] sm:$0xff] }
 0x167   : > { %v2631_v47 = vmul.f32 %v6021_v38, %v5397_v36  ;;  %v2775_v43 = vsel %vm2737_vm4, %v2773_v5, %v2774_v3  ;;  %v2668_v4 = vmul.f32 %v5007_v25, %v2149_v11  ;;  %v2835_v59 = vmul.f32 %v6022_v53, %v5397_v36 }
 0x168   : > { %v2632_v54 = vmul.f32 %v6021_v38, %v5401_v27  ;;  %v2776_v49 = vrot.slane %v2712_v26, 1  ;;  %v2836_v60 = vmul.f32 %v6022_v53, %v5401_v27  ;;  %v5421_v12 = vmul.f32 %v5010_v17, %v2149_v11 }
 0x169   : > { %v2647_v34 = vadd.f32 %v2631_v47, %v2595_v2  ;;  %v2897_v31 = vrot.slane %v2835_v59, 1  ;;  %v5424_v19 = vmul.f32 %v5387_v6, %v2149_v11  ;;  %v2900_v0 = vrot.slane %v2837_v61, 1  ;;  %v6024_v11 = vld [vmem:[#allocation6_spill] sm:$0xff] }
 0x16a   : > { %v2648_v24 = vadd.f32 %v2632_v54, %v2596_v45  ;;  %v2777_v52 = vsel %vm2737_vm4, %v2774_v3, %v2776_v49  ;;  %v2898_v51 = vrot.slane %v2836_v60, 1  ;;  %v3022_v7 = vrot.slane %v5421_v12, 1 }
 0x16b   : > { %v2683_v40 = vadd.f32 %v2667_v58, %v2647_v34  ;;  %v3395_v5 = vrot.slane %v5424_v19, 2  ;;  %v2938_v2 = vmul.f32 %v5010_v17, %v6023_v10  ;;  %v3187_v45 = vmul.f32 %v4997_v20, %v6024_v11 }
 0x16c   : > { %v2684_v26 = vadd.f32 %v2668_v4, %v2648_v24  ;;  %v2899_v47 = vsel %vm2737_vm4, %v2897_v31, %v2898_v51  ;;  %v2901_v59 = vsel %vm2737_vm4, %v2898_v51, %v2900_v0  ;;  %v3023_v3 = vsel %vm2737_vm4, %v3021_v57, %v3022_v7 }
 0x16d   : > { %v2808_v54 = vadd.f32 %v2775_v43, %v2683_v40  ;;  %v2986_v49 = vrot.slane %v2938_v2, 1  ;;  %v3311_v58 = vmul.f32 %v5387_v6, %v6023_v10  ;;  %v3235_v61 = vrot.slane %v3187_v45, 2 }
 0x16e   : > { %v2809_v60 = vadd.f32 %v2777_v52, %v2684_v26  ;;  %v3312_v34 = vmul.f32 %v5387_v6, %v5151_v41  ;;  %v1978_v4 = vadd.f32 %v4959_v29, %v5187_v44  ;;  %v6025_v12 = vrot.slane %v5200_v14, 1 }
 0x16f   : > { %v2932_v31 = vadd.f32 %v2899_v47, %v2808_v54  ;;  %v3359_v43 = vrot.slane %v3311_v58, 2  ;;  %v3313_v57 = vmul.f32 %v5387_v6, %v5132_v32  ;;  %v6026_v52 = vrot.slane %v5218_v15, 2  ;;  %v5464_v54 = vld [vmem:[%s5982_s6] ss:$0 sm:$0xff] }
 0x170   : > { %v2988_v24 = vsel %vm2737_vm4, %v2986_v49, %v6025_v12  ;;  %v2933_v51 = vadd.f32 %v2901_v59, %v2809_v60  ;;  %v3360_v2 = vrot.slane %v3312_v34, 2  ;;  %v1983_v29 = vmax.f32 %v1978_v4, 0.0 }
 0x171   : > { %v3042_v0 = vadd.f32 %v2988_v24, %v5189_v46  ;;  %v3237_v40 = vsel %vm3110_vm5, %v3235_v61, %v6026_v52  ;;  %v5451_v26 = vadd.f32 %v3023_v3, %v2932_v31  ;;  %v3362_v44 = vrot.slane %v3313_v57, 2  ;;  %v6027_v46 = vld [vmem:[#allocation10_spill] sm:$0xff]  ;;  %v6028_v3 = vld [vmem:[#allocation3_spill] sm:$0xff] }
 0x172   : > { %v2583_v14 = vmul.f32 %v5003_v23, %v6024_v11  ;;  %v3361_v45 = vsel %vm3110_vm5, %v3359_v43, %v3360_v2  ;;  %v2619_v59 = vmul.f32 %v6021_v38, %v6023_v10  ;;  %v2655_v15 = vmul.f32 %v5007_v25, %v6027_v46 }
 0x173   : > { %v3167_v47 = vadd.f32 %v5180_v37, %v3042_v0  ;;  %v2144_v49 = vmul.f32 %v6028_v3, %v1983_v29  ;;  %v3363_v58 = vsel %vm3110_vm5, %v3360_v2, %v3362_v44  ;;  %v2692_v37 = vmul.f32 %v4990_v13, %v6024_v11 }
 0x174   : > { %v2693_v60 = vmul.f32 %v4990_v13, %v5061_v62  ;;  %v3416_v34 = vadd.f32 %v3363_v58, %v5257_v1  ;;  %v2635_v4 = vadd.f32 %v2619_v59, %v2583_v14  ;;  %v2817_v31 = vmul.f32 %v6022_v53, %v6023_v10 }
 0x175   : > { %v3291_v61 = vadd.f32 %v3237_v40, %v3167_v47  ;;  %v2150_v12 = vsel %vm5341_vm6, %v2144_v49, 0.0  ;;  %v2743_v24 = vrot.slane %v2692_v37, 1  ;;  %v2818_v57 = vmul.f32 %v6022_v53, %v5151_v41 }
 0x176   : > { %v2744_v43 = vrot.slane %v2693_v60, 1  ;;  %v2961_v52 = vmul.f32 %v5010_v17, %v2150_v12  ;;  %v5481_v2 = vmul.f32 %v5387_v6, %v2150_v12  ;;  %v3439_v1 = vadd.f32 %v5464_v54, %v3416_v34 }
 0x177   : > { %v3415_v0 = vadd.f32 %v3361_v45, %v3291_v61  ;;  %v2671_v40 = vadd.f32 %v2655_v15, %v2635_v4  ;;  %v2867_v44 = vrot.slane %v2817_v31, 1  ;;  %v2868_v14 = vrot.slane %v2818_v57, 1 }
 0x178   : > { %v2745_v29 = vsel %vm2737_vm4, %v2743_v24, %v2744_v43  ;;  %v3024_v47 = vrot.slane %v2961_v52, 1  ;;  %v3397_v59 = vrot.slane %v5481_v2, 2  ;;  %v3455_v3 = vmax.f32 %v3439_v1, 0.0 }
 0x179   : > { %v3438_v33 = vadd.f32 %v5464_v54, %v3415_v0  ;;  %v2796_v49 = vadd.f32 %v2745_v29, %v2671_v40  ;;  %v2869_v45 = vsel %vm2737_vm4, %v2867_v44, %v2868_v14  ;;  %v2941_v58 = vmul.f32 %v5010_v17, %v6027_v46 }
 0x17a   : > { %v2942_v37 = vmul.f32 %v5010_v17, %v5231_v9  ;;  %v3025_v60 = vsel %vm2737_vm4, %v3022_v7, %v3024_v47  ;;  %v3065_v61 = vmul.f32 %v4994_v16, %v6024_v11  ;;  %v3066_v34 = vmul.f32 %v4994_v16, %v5061_v62 }
 0x17b   : > { %v3454_v15 = vmax.f32 %v3438_v33, 0.0  ;;  %v5497_v4 = vadd.f32 %v3025_v60, %v2933_v51  ;;  %v2920_v31 = vadd.f32 %v2869_v45, %v2796_v49  ;;  %v2991_v12 = vrot.slane %v2941_v58, 1  ;;  %v6029_v60 = vld [vmem:[#allocation7_spill] sm:$0xff] }
 0x17c   : > { %v2992_v24 = vrot.slane %v2942_v37, 1  ;;  %v3116_v57 = vrot.slane %v3065_v61, 2  ;;  %v3117_v0 = vrot.slane %v3066_v34, 2  ;;  %v3190_v52 = vmul.f32 %v4997_v20, %v6023_v10 }
 0x17d   : > { %4206 = vmatprep.mubr.f32.mxu0 %v3454_v15  ;;  %v3191_v7 = vmul.f32 %v4997_v20, %v5151_v41  ;;  %v3314_v1 = vmul.f32 %v5387_v6, %v6027_v46  ;;  %v3315_v51 = vmul.f32 %v5387_v6, %v5231_v9  ;;  %v2584_v40 = vmul.f32 %v5003_v23, %v5061_v62 }
 0x17e   : > { %4207 = vmatmul.mubr.f32.vlgmr.msra.gmra.mrb[18].mxu0 %v3455_v3  ;;  %v2993_v11 = vsel %vm2737_vm4, %v2991_v12, %v2992_v24  ;;  %v3118_v44 = vsel %vm3110_vm5, %v3116_v57, %v3117_v0  ;;  %v3240_v33 = vrot.slane %v3190_v52, 2  ;;  %v2620_v3 = vmul.f32 %v6021_v38, %v5151_v41  ;;  %v6031_v52 = vld [vmem:[#allocation8_spill] sm:$0xff] }
 0x17f   : > { %v3044_v29 = vadd.f32 %v2993_v11, %v2920_v31  ;;  %v3241_v47 = vrot.slane %v3191_v7, 2  ;;  %v3364_v49 = vrot.slane %v3314_v1, 2  ;;  %v3365_v45 = vrot.slane %v3315_v51, 2 }
 0x180   : > { %v2656_v58 = vmul.f32 %v5007_v25, %v5231_v9  ;;  %v6030_v61 = vrot.slane %v6029_v60, 1  ;;  %v2819_v34 = vmul.f32 %v6022_v53, %v5132_v32  ;;  %v2636_v12 = vadd.f32 %v2620_v3, %v2584_v40 }
 0x181   : > { %v3169_v37 = vadd.f32 %v3118_v44, %v3044_v29  ;;  %v3242_v15 = vsel %vm3110_vm5, %v3240_v33, %v3241_v47  ;;  %v3366_v31 = vsel %vm3110_vm5, %v3364_v49, %v3365_v45  ;;  %v2943_v57 = vmul.f32 %v5010_v17, %v5212_v55 }
 0x182   : > { %v2747_v62 = vsel %vm2737_vm4, %v2744_v43, %v6030_v61  ;;  %v6032_v7 = vrot.slane %v6031_v52, 2  ;;  %v2870_v51 = vrot.slane %v2819_v34, 1  ;;  %v3192_v29 = vmul.f32 %v4997_v20, %v5132_v32 }
 0x183   : > { %v3293_v1 = vadd.f32 %v3242_v15, %v3169_v37  ;;  %v3316_v43 = vmul.f32 %v5387_v6, %v5212_v55  ;;  %v2672_v44 = vadd.f32 %v2656_v58, %v2636_v12  ;;  %v2994_v33 = vrot.slane %v2943_v57, 1 }
 0x184   : > { %v3120_v11 = vsel %vm3110_vm5, %v3117_v0, %v6032_v7  ;;  %v2585_v40 = vmul.f32 %v5003_v23, %v6023_v10  ;;  %v2621_v49 = vmul.f32 %v6021_v38, %v6027_v46  ;;  %v2871_v60 = vsel %vm2737_vm4, %v2868_v14, %v2870_v51 }
 0x185   : > { %v3417_v3 = vadd.f32 %v3366_v31, %v3293_v1  ;;  %v3243_v0 = vrot.slane %v3192_v29, 2  ;;  %v3367_v37 = vrot.slane %v3316_v43, 2  ;;  %v2797_v15 = vadd.f32 %v2747_v62, %v2672_v44 }
 0x186   : > { %v2995_v61 = vsel %vm2737_vm4, %v2992_v24, %v2994_v33  ;;  %v2637_v34 = vadd.f32 %v2621_v49, %v2585_v40  ;;  %v2657_v52 = vmul.f32 %v5007_v25, %v5241_v48  ;;  %v2695_v31 = vmul.f32 %v4990_v13, %v6023_v10 }
 0x187   : > { %v3440_v58 = vadd.f32 %v5464_v54, %v3417_v3  ;;  %v3244_v12 = vsel %vm3110_vm5, %v3241_v47, %v3243_v0  ;;  %v3368_v57 = vsel %vm3110_vm5, %v3365_v45, %v3367_v37  ;;  %v2921_v7 = vadd.f32 %v2871_v60, %v2797_v15 }
 0x188   : > { %v2673_v14 = vadd.f32 %v2657_v52, %v2637_v34  ;;  %v2696_v62 = vmul.f32 %v4990_v13, %v5151_v41  ;;  %v2820_v24 = vmul.f32 %v6022_v53, %v6027_v46  ;;  %v2748_v51 = vrot.slane %v2695_v31, 1 }
 0x189   : > { %v3456_v1 = vmax.f32 %v3440_v58, 0.0  ;;  %v2821_v29 = vmul.f32 %v6022_v53, %v5231_v9  ;;  %v2944_v47 = vmul.f32 %v5010_v17, %v5241_v48  ;;  %v3045_v45 = vadd.f32 %v2995_v61, %v2921_v7 }
 0x18a   : > { %v2749_v43 = vrot.slane %v2696_v62, 1  ;;  %v2872_v44 = vrot.slane %v2820_v24, 1  ;;  %v2945_v33 = vmul.f32 %v5010_v17, %v5277_v28  ;;  %v3068_v3 = vmul.f32 %v4994_v16, %v6023_v10 }
 0x18b   : > { %4209 = vmatprep.mubr.f32.mxu0 %v3456_v1  ;;  %v2873_v40 = vrot.slane %v2821_v29, 1  ;;  %v2996_v49 = vrot.slane %v2944_v47, 1  ;;  %v3069_v60 = vmul.f32 %v4994_v16, %v5151_v41  ;;  %v3170_v0 = vadd.f32 %v3120_v11, %v3045_v45 }
 0x18c   : > { %v2750_v37 = vsel %vm2737_vm4, %v2748_v51, %v2749_v43  ;;  %v2997_v15 = vrot.slane %v2945_v33, 1  ;;  %v3193_v61 = vmul.f32 %v4997_v20, %v6027_v46  ;;  %v3121_v58 = vrot.slane %v3068_v3, 2 }
 0x18d   : > { %v2798_v34 = vadd.f32 %v2750_v37, %v2673_v14  ;;  %v2874_v52 = vsel %vm2737_vm4, %v2872_v44, %v2873_v40  ;;  %v3122_v31 = vrot.slane %v3069_v60, 2  ;;  %v3294_v7 = vadd.f32 %v3244_v12, %v3170_v0 }
 0x18e   : > { %v2998_v62 = vsel %vm2737_vm4, %v2996_v49, %v2997_v15  ;;  %v3194_v10 = vmul.f32 %v4997_v20, %v5231_v9  ;;  %v3245_v24 = vrot.slane %v3193_v61, 2  ;;  %v3317_v51 = vmul.f32 %v5387_v6, %v5241_v48 }
 0x18f   : > { %v2922_v1 = vadd.f32 %v2874_v52, %v2798_v34  ;;  %v3123_v11 = vsel %vm3110_vm5, %v3121_v58, %v3122_v31  ;;  %v3318_v14 = vmul.f32 %v5387_v6, %v5277_v28  ;;  %v3418_v29 = vadd.f32 %v3368_v57, %v3294_v7 }
 0x190   : > { %v3246_v47 = vrot.slane %v3194_v10, 2  ;;  %v2586_v12 = vmul.f32 %v5003_v23, %v5151_v41  ;;  %v2622_v45 = vmul.f32 %v6021_v38, %v5231_v9  ;;  %v3369_v33 = vrot.slane %v3317_v51, 2 }
 0x191   : > { %v3046_v44 = vadd.f32 %v2998_v62, %v2922_v1  ;;  %v3370_v49 = vrot.slane %v3318_v14, 2  ;;  %v2658_v3 = vmul.f32 %v5007_v25, %v5277_v28  ;;  %v3441_v60 = vadd.f32 %v5464_v54, %v3418_v29 }
 0x192   : > { %v3247_v0 = vsel %vm3110_vm5, %v3245_v24, %v3246_v47  ;;  %v2638_v37 = vadd.f32 %v2622_v45, %v2586_v12  ;;  %v2697_v57 = vmul.f32 %v4990_v13, %v5132_v32  ;;  %v2822_v34 = vmul.f32 %v6022_v53, %v5212_v55 }
 0x193   : > { %v3171_v61 = vadd.f32 %v3123_v11, %v3046_v44  ;;  %v3371_v41 = vsel %vm3110_vm5, %v3369_v33, %v3370_v49  ;;  %v2946_v52 = vmul.f32 %v5010_v17, %v5268_v30  ;;  %v3457_v58 = vmax.f32 %v3441_v60, 0.0 }
 0x194   : > { %v2674_v7 = vadd.f32 %v2658_v3, %v2638_v37  ;;  %v2751_v62 = vrot.slane %v2697_v57, 1  ;;  %v3070_v10 = vmul.f32 %v4994_v16, %v5132_v32  ;;  %v2875_v1 = vrot.slane %v2822_v34, 1 }
 0x195   : > { %v3295_v24 = vadd.f32 %v3247_v0, %v3171_v61  ;;  %v2999_v51 = vrot.slane %v2946_v52, 1  ;;  %v3195_v11 = vmul.f32 %v4997_v20, %v5212_v55  ;;  %4210 = vmatmul.mubr.f32.gmra.mrb[20].mxu0 %v3457_v58  ;;  %v3319_v12 = vmul.f32 %v5387_v6, %v5268_v30 }
 0x196   : > { %v2752_v14 = vsel %vm2737_vm4, %v2749_v43, %v2751_v62  ;;  %v3124_v29 = vrot.slane %v3070_v10, 2  ;;  %v2587_v45 = vmul.f32 %v5003_v23, %v6027_v46  ;;  %v2876_v32 = vsel %vm2737_vm4, %v2873_v40, %v2875_v1 }
 0x197   : > { %v3419_v44 = vadd.f32 %v3371_v41, %v3295_v24  ;;  %v2799_v33 = vadd.f32 %v2752_v14, %v2674_v7  ;;  %v3000_v3 = vsel %vm2737_vm4, %v2997_v15, %v2999_v51  ;;  %v3248_v0 = vrot.slane %v3195_v11, 2 }
 0x198   : > { %v3125_v60 = vsel %vm3110_vm5, %v3122_v31, %v3124_v29  ;;  %v3372_v37 = vrot.slane %v3319_v12, 2  ;;  %v2623_v43 = vmul.f32 %v6021_v38, %v5241_v48  ;;  %v2659_v34 = vmul.f32 %v5007_v25, %v5284_v35 }
 0x199   : > { %v3442_v57 = vadd.f32 %v5464_v54, %v3419_v44  ;;  %v2923_v61 = vadd.f32 %v2876_v32, %v2799_v33  ;;  %v2698_v41 = vmul.f32 %v4990_v13, %v6027_v46  ;;  %v3249_v40 = vsel %vm3110_vm5, %v3246_v47, %v3248_v0 }
 0x19a   : > { %v3373_v15 = vsel %vm3110_vm5, %v3370_v49, %v3372_v37  ;;  %v2639_v52 = vadd.f32 %v2623_v43, %v2587_v45  ;;  %v2699_v31 = vmul.f32 %v4990_v13, %v5231_v9  ;;  %v2823_v10 = vmul.f32 %v6022_v53, %v5241_v48 }
 0x19b   : > { %v3458_v58 = vmax.f32 %v3442_v57, 0.0  ;;  %v3047_v7 = vadd.f32 %v3000_v3, %v2923_v61  ;;  %v2753_v62 = vrot.slane %v2698_v41, 1  ;;  %v2824_v51 = vmul.f32 %v6022_v53, %v5277_v28 }
 0x19c   : > { %v2675_v24 = vadd.f32 %v2659_v34, %v2639_v52  ;;  %v2754_v1 = vrot.slane %v2699_v31, 1  ;;  %v2947_v47 = vmul.f32 %v5010_v17, %v5284_v35  ;;  %v2877_v11 = vrot.slane %v2823_v10, 1 }
 0x19d   : > { %4212 = vmatprep.mubr.f32.mxu0 %v3458_v58  ;;  %v3172_v49 = vadd.f32 %v3125_v60, %v3047_v7  ;;  %v2948_v14 = vmul.f32 %v5010_v17, %v5308_v18  ;;  %v3071_v29 = vmul.f32 %v4994_v16, %v6027_v46  ;;  %v2878_v45 = vrot.slane %v2824_v51, 1 }
 0x19e   : > { %v2755_v12 = vsel %vm2737_vm4, %v2753_v62, %v2754_v1  ;;  %v3001_v44 = vrot.slane %v2947_v47, 1  ;;  %v3072_v33 = vmul.f32 %v4994_v16, %v5231_v9  ;;  %v3196_v57 = vmul.f32 %v4997_v20, %v5241_v48 }
 0x19f   : > { %v3296_v32 = vadd.f32 %v3249_v40, %v3172_v49  ;;  %v2800_v3 = vadd.f32 %v2755_v12, %v2675_v24  ;;  %v3002_v0 = vrot.slane %v2948_v14, 1  ;;  %v3126_v37 = vrot.slane %v3071_v29, 2 }
 0x1a0   : > { %v2879_v60 = vsel %vm2737_vm4, %v2877_v11, %v2878_v45  ;;  %v3127_v43 = vrot.slane %v3072_v33, 2  ;;  %v3197_v46 = vmul.f32 %v4997_v20, %v5277_v28  ;;  %v3320_v52 = vmul.f32 %v5387_v6, %v5284_v35 }
 0x1a1   : > { %v3420_v61 = vadd.f32 %v3373_v15, %v3296_v32  ;;  %v2924_v34 = vadd.f32 %v2879_v60, %v2800_v3  ;;  %v3003_v41 = vsel %vm2737_vm4, %v3001_v44, %v3002_v0  ;;  %v3250_v31 = vrot.slane %v3196_v57, 2 }
 0x1a2   : > { %v3128_v40 = vsel %vm3110_vm5, %v3126_v37, %v3127_v43  ;;  %v3251_v58 = vrot.slane %v3197_v46, 2  ;;  %v3321_v7 = vmul.f32 %v5387_v6, %v5308_v18  ;;  %v3374_v24 = vrot.slane %v3320_v52, 2 }
 0x1a3   : > { %v3443_v62 = vadd.f32 %v5464_v54, %v3420_v61  ;;  %v3048_v10 = vadd.f32 %v3003_v41, %v2924_v34  ;;  %v2588_v15 = vmul.f32 %v5003_v23, %v5231_v9  ;;  %v2624_v49 = vmul.f32 %v6021_v38, %v5277_v28 }
 0x1a4   : > { %v3252_v51 = vsel %vm3110_vm5, %v3250_v31, %v3251_v58  ;;  %v3375_v47 = vrot.slane %v3321_v7, 2  ;;  %v2660_v11 = vmul.f32 %v5007_v25, %v5308_v18  ;;  %v2700_v12 = vmul.f32 %v4990_v13, %v5212_v55 }
 0x1a5   : > { %v3459_v14 = vmax.f32 %v3443_v62, 0.0  ;;  %v3173_v29 = vadd.f32 %v3128_v40, %v3048_v10  ;;  %v2825_v44 = vmul.f32 %v6022_v53, %v5268_v30  ;;  %v2640_v9 = vadd.f32 %v2624_v49, %v2588_v15 }
 0x1a6   : > { %v3376_v33 = vsel %vm3110_vm5, %v3374_v24, %v3375_v47  ;;  %v2949_v32 = vmul.f32 %v5010_v17, %v5280_v56  ;;  %v3073_v3 = vmul.f32 %v4994_v16, %v5212_v55  ;;  %v2756_v60 = vrot.slane %v2700_v12, 1 }
 0x1a7   : > { %4213 = vmatmul.mubr.f32.gmra.mrb[22].mxu0 %v3459_v14  ;;  %v3297_v37 = vadd.f32 %v3252_v51, %v3173_v29  ;;  %v2880_v57 = vrot.slane %v2825_v44, 1  ;;  %v3198_v46 = vmul.f32 %v4997_v20, %v5268_v30  ;;  %v2676_v61 = vadd.f32 %v2660_v11, %v2640_v9 }
 0x1a8   : > { %v3004_v34 = vrot.slane %v2949_v32, 1  ;;  %v3129_v41 = vrot.slane %v3073_v3, 2  ;;  %v3322_v52 = vmul.f32 %v5387_v6, %v5280_v56  ;;  %v2757_v31 = vsel %vm2737_vm4, %v2754_v1, %v2756_v60 }
 0x1a9   : > { %v3421_v40 = vadd.f32 %v3376_v33, %v3297_v37  ;;  %v2881_v7 = vsel %vm2737_vm4, %v2878_v45, %v2880_v57  ;;  %v3253_v62 = vrot.slane %v3198_v46, 2  ;;  %v2801_v55 = vadd.f32 %v2757_v31, %v2676_v61  ;;  %v6033_v57 = vld [vmem:[#allocation12_spill] sm:$0xff] }
 0x1aa   : > { %v3005_v10 = vsel %vm2737_vm4, %v3002_v0, %v3004_v34  ;;  %v3130_v24 = vsel %vm3110_vm5, %v3127_v43, %v3129_v41  ;;  %v3377_v15 = vrot.slane %v3322_v52, 2  ;;  %v2589_v11 = vmul.f32 %v5003_v23, %v5241_v48 }
 0x1ab   : > { %v3444_v51 = vadd.f32 %v5464_v54, %v3421_v40  ;;  %v3254_v49 = vsel %vm3110_vm5, %v3251_v58, %v3253_v62  ;;  %v2625_v14 = vmul.f32 %v6021_v38, %v5284_v35  ;;  %v2925_v1 = vadd.f32 %v2881_v7, %v2801_v55 }
 0x1ac   : > { %v3378_v45 = vsel %vm3110_vm5, %v3375_v47, %v3377_v15  ;;  %v2661_v29 = vmul.f32 %v5007_v25, %v5323_v63  ;;  %v2701_v0 = vmul.f32 %v4990_v13, %v5241_v48  ;;  %v2702_v58 = vmul.f32 %v4990_v13, %v5277_v28 }
 0x1ad   : > { %v3460_v43 = vmax.f32 %v3444_v51, 0.0  ;;  %v2641_v12 = vadd.f32 %v2625_v14, %v2589_v11  ;;  %v2826_v44 = vmul.f32 %v6022_v53, %v5284_v35  ;;  %v3049_v33 = vadd.f32 %v3005_v10, %v2925_v1 }
 0x1ae   : > { %v2758_v9 = vrot.slane %v2701_v0, 1  ;;  %v2827_v32 = vmul.f32 %v6022_v53, %v5308_v18  ;;  %v2950_v47 = vmul.f32 %v5010_v17, %v5323_v63  ;;  %v2759_v37 = vrot.slane %v2702_v58, 1 }
 0x1af   : > { %4215 = vmatprep.mubr.f32.mxu0 %v3460_v43  ;;  %v2677_v3 = vadd.f32 %v2661_v29, %v2641_v12  ;;  %v2882_v60 = vrot.slane %v2826_v44, 1  ;;  %v2951_v46 = vmul.f32 %v5010_v17, %v6033_v57  ;;  %v3174_v61 = vadd.f32 %v3130_v24, %v3049_v33 }
 0x1b0   : > { %v2883_v34 = vrot.slane %v2827_v32, 1  ;;  %v3006_v41 = vrot.slane %v2950_v47, 1  ;;  %v3074_v52 = vmul.f32 %v4994_v16, %v5241_v48  ;;  %v2760_v40 = vsel %vm2737_vm4, %v2758_v9, %v2759_v37 }
 0x1b1   : > { %v3007_v31 = vrot.slane %v2951_v46, 1  ;;  %v3075_v7 = vmul.f32 %v4994_v16, %v5277_v28  ;;  %v3199_v62 = vmul.f32 %v4997_v20, %v5284_v35  ;;  %v3298_v55 = vadd.f32 %v3254_v49, %v3174_v61 }
 0x1b2   : > { %v2802_v10 = vadd.f32 %v2760_v40, %v2677_v3  ;;  %v2884_v15 = vsel %vm2737_vm4, %v2882_v60, %v2883_v34  ;;  %v3131_v51 = vrot.slane %v3074_v52, 2  ;;  %v3200_v48 = vmul.f32 %v4997_v20, %v5308_v18 }
 0x1b3   : > { %v3008_v24 = vsel %vm2737_vm4, %v3006_v41, %v3007_v31  ;;  %v3132_v11 = vrot.slane %v3075_v7, 2  ;;  %v3255_v14 = vrot.slane %v3199_v62, 2  ;;  %v3422_v1 = vadd.f32 %v3378_v45, %v3298_v55  ;;  %v6034_v62 = vld [vmem:[#allocation11_spill] sm:$0xff] }
 0x1b4   : > { %v2926_v29 = vadd.f32 %v2884_v15, %v2802_v10  ;;  %v3323_v0 = vmul.f32 %v5387_v6, %v5323_v63  ;;  %v3324_v43 = vmul.f32 %v5387_v6, %v6033_v57  ;;  %v3256_v12 = vrot.slane %v3200_v48, 2 }
 0x1b5   : > { %v3133_v49 = vsel %vm3110_vm5, %v3131_v51, %v3132_v11  ;;  %v2590_v58 = vmul.f32 %v5003_v23, %v5277_v28  ;;  %v2626_v44 = vmul.f32 %v6021_v38, %v5308_v18  ;;  %v3445_v33 = vadd.f32 %v5464_v54, %v3422_v1 }
 0x1b6   : > { %v3050_v9 = vadd.f32 %v3008_v24, %v2926_v29  ;;  %v3379_v45 = vrot.slane %v3323_v0, 2  ;;  %v3380_v32 = vrot.slane %v3324_v43, 2  ;;  %v3257_v47 = vsel %vm3110_vm5, %v3255_v14, %v3256_v12 }
 0x1b7   : > { %v2642_v3 = vadd.f32 %v2626_v44, %v2590_v58  ;;  %v2662_v60 = vmul.f32 %v5007_v25, %v6033_v57  ;;  %v2703_v46 = vmul.f32 %v4990_v13, %v5268_v30  ;;  %v3461_v61 = vmax.f32 %v3445_v33, 0.0 }
 0x1b8   : > { %v3175_v41 = vadd.f32 %v3133_v49, %v3050_v9  ;;  %v3381_v28 = vsel %vm3110_vm5, %v3379_v45, %v3380_v32  ;;  %v2828_v52 = vmul.f32 %v6022_v53, %v5280_v56  ;;  %v2952_v55 = vmul.f32 %v5010_v17, %v6034_v62 }
 0x1b9   : > { %v2678_v40 = vadd.f32 %v2662_v60, %v2642_v3  ;;  %v2761_v7 = vrot.slane %v2703_v46, 1  ;;  %v3076_v10 = vmul.f32 %v4994_v16, %v5268_v30  ;;  %4216 = vmatmul.mubr.f32.gmra.mrb[24].mxu0 %v3461_v61  ;;  %v3201_v24 = vmul.f32 %v4997_v20, %v5280_v56 }
 0x1ba   : > { %v3299_v15 = vadd.f32 %v3257_v47, %v3175_v41  ;;  %v2885_v51 = vrot.slane %v2828_v52, 1  ;;  %v3325_v48 = vmul.f32 %v5387_v6, %v6034_v62  ;;  %v3009_v1 = vrot.slane %v2952_v55, 1 }
 0x1bb   : > { %v2762_v14 = vsel %vm2737_vm4, %v2759_v37, %v2761_v7  ;;  %v3134_v29 = vrot.slane %v3076_v10, 2  ;;  %v2591_v0 = vmul.f32 %v5003_v23, %v5284_v35  ;;  %v3258_v58 = vrot.slane %v3201_v24, 2 }
 0x1bc   : > { %v3423_v43 = vadd.f32 %v3381_v28, %v3299_v15  ;;  %v2803_v49 = vadd.f32 %v2762_v14, %v2678_v40  ;;  %v2886_v30 = vsel %vm2737_vm4, %v2883_v34, %v2885_v51  ;;  %v3010_v44 = vsel %vm2737_vm4, %v3007_v31, %v3009_v1 }
 0x1bd   : > { %v3135_v33 = vsel %vm3110_vm5, %v3132_v11, %v3134_v29  ;;  %v3382_v9 = vrot.slane %v3325_v48, 2  ;;  %v2627_v45 = vmul.f32 %v6021_v38, %v5323_v63  ;;  %v3259_v3 = vsel %vm3110_vm5, %v3256_v12, %v3258_v58 }
 0x1be   : > { %v3446_v37 = vadd.f32 %v5464_v54, %v3423_v43  ;;  %v2927_v47 = vadd.f32 %v2886_v30, %v2803_v49  ;;  %v2663_v60 = vmul.f32 %v5007_v25, %v5362_v22  ;;  %v2704_v31 = vmul.f32 %v4990_v13, %v5284_v35 }
 0x1bf   : > { %v3383_v46 = vsel %vm3110_vm5, %v3380_v32, %v3382_v9  ;;  %v2643_v34 = vadd.f32 %v2627_v45, %v2591_v0  ;;  %v2705_v11 = vmul.f32 %v4990_v13, %v5308_v18  ;;  %v2829_v28 = vmul.f32 %v6022_v53, %v5323_v63 }
 0x1c0   : > { %v3462_v61 = vmax.f32 %v3446_v37, 0.0  ;;  %v3051_v41 = vadd.f32 %v3010_v44, %v2927_v47  ;;  %v2830_v12 = vmul.f32 %v6022_v53, %v6033_v57  ;;  %v2763_v40 = vrot.slane %v2704_v31, 1 }
 0x1c1   : > { %v2679_v52 = vadd.f32 %v2663_v60, %v2643_v34  ;;  %v2764_v7 = vrot.slane %v2705_v11, 1  ;;  %v2953_v32 = vmul.f32 %v5010_v17, %v5362_v22  ;;  %v2887_v10 = vrot.slane %v2829_v28, 1 }
 0x1c2   : > { %4218 = vmatprep.mubr.f32.mxu0 %v3462_v61  ;;  %v3176_v55 = vadd.f32 %v3135_v33, %v3051_v41  ;;  %v2888_v15 = vrot.slane %v2830_v12, 1  ;;  %v2954_v51 = vmul.f32 %v5010_v17, %v5372_v42  ;;  %v3077_v14 = vmul.f32 %v4994_v16, %v5284_v35 }
 0x1c3   : > { %v2765_v24 = vsel %vm2737_vm4, %v2763_v40, %v2764_v7  ;;  %v3011_v48 = vrot.slane %v2953_v32, 1  ;;  %v3078_v1 = vmul.f32 %v4994_v16, %v5308_v18  ;;  %v3202_v44 = vmul.f32 %v4997_v20, %v5323_v63 }
 0x1c4   : > { %v3300_v29 = vadd.f32 %v3259_v3, %v3176_v55  ;;  %v2804_v0 = vadd.f32 %v2765_v24, %v2679_v52  ;;  %v2889_v43 = vsel %vm2737_vm4, %v2887_v10, %v2888_v15  ;;  %v3012_v49 = vrot.slane %v2954_v51, 1 }
 0x1c5   : > { %v3136_v30 = vrot.slane %v3077_v14, 2  ;;  %v3137_v58 = vrot.slane %v3078_v1, 2  ;;  %v3203_v33 = vmul.f32 %v4997_v20, %v6033_v57  ;;  %v3326_v37 = vmul.f32 %v5387_v6, %v5362_v22 }
 0x1c6   : > { %v3424_v9 = vadd.f32 %v3383_v46, %v3300_v29  ;;  %v2928_v45 = vadd.f32 %v2889_v43, %v2804_v0  ;;  %v3013_v35 = vsel %vm2737_vm4, %v3011_v48, %v3012_v49  ;;  %v3260_v3 = vrot.slane %v3202_v44, 2 }
 0x1c7   : > { %v3138_v47 = vsel %vm3110_vm5, %v3136_v30, %v3137_v58  ;;  %v3261_v60 = vrot.slane %v3203_v33, 2  ;;  %v3327_v34 = vmul.f32 %v5387_v6, %v5372_v42  ;;  %v3384_v61 = vrot.slane %v3326_v37, 2 }
 0x1c8   : > { %v3447_v31 = vadd.f32 %v5464_v54, %v3424_v9  ;;  %v3052_v11 = vadd.f32 %v3013_v35, %v2928_v45  ;;  %v2592_v46 = vmul.f32 %v5003_v23, %v5308_v18  ;;  %v2628_v12 = vmul.f32 %v6021_v38, %v6033_v57 }
 0x1c9   : > { %v3262_v41 = vsel %vm3110_vm5, %v3260_v3, %v3261_v60  ;;  %v3385_v28 = vrot.slane %v3327_v34, 2  ;;  %v2664_v52 = vmul.f32 %v5007_v25, %v5372_v42  ;;  %v2706_v55 = vmul.f32 %v4990_v13, %v5280_v56 }
 0x1ca   : > { %v3463_v40 = vmax.f32 %v3447_v31, 0.0  ;;  %v3177_v32 = vadd.f32 %v3138_v47, %v3052_v11  ;;  %v2831_v10 = vmul.f32 %v6022_v53, %v6034_v62  ;;  %v2644_v18 = vadd.f32 %v2628_v12, %v2592_v46 }
 0x1cb   : > { %v3386_v51 = vsel %vm3110_vm5, %v3384_v61, %v3385_v28  ;;  %v2955_v24 = vmul.f32 %v5010_v17, %v5330_v50  ;;  %v3079_v48 = vmul.f32 %v4994_v16, %v5280_v56  ;;  %v2766_v1 = vrot.slane %v2706_v55, 1 }
 0x1cc   : > { %4219 = vmatmul.mubr.f32.gmra.mrb[26].mxu0 %v3463_v40  ;;  %v3301_v14 = vadd.f32 %v3262_v41, %v3177_v32  ;;  %v2890_v29 = vrot.slane %v2831_v10, 1  ;;  %v3204_v0 = vmul.f32 %v4997_v20, %v6034_v62  ;;  %v2680_v43 = vadd.f32 %v2664_v52, %v2644_v18 }
 0x1cd   : > { %v3014_v30 = vrot.slane %v2955_v24, 1  ;;  %v3139_v44 = vrot.slane %v3079_v48, 2  ;;  %v3328_v33 = vmul.f32 %v5387_v6, %v5330_v50  ;;  %v2767_v45 = vsel %vm2737_vm4, %v2764_v7, %v2766_v1 }
 0x1ce   : > { %v3425_v9 = vadd.f32 %v3386_v51, %v3301_v14  ;;  %v2891_v35 = vsel %vm2737_vm4, %v2888_v15, %v2890_v29  ;;  %v3263_v37 = vrot.slane %v3204_v0, 2  ;;  %v2805_v56 = vadd.f32 %v2767_v45, %v2680_v43 }
 0x1cf   : > { %v3015_v47 = vsel %vm2737_vm4, %v3012_v49, %v3014_v30  ;;  %v3140_v3 = vsel %vm3110_vm5, %v3137_v58, %v3139_v44  ;;  %v3387_v34 = vrot.slane %v3328_v33, 2  ;;  %v2593_v61 = vmul.f32 %v5003_v23, %v5323_v63 }
 0x1d0   : > { %v3448_v31 = vadd.f32 %v5464_v54, %v3425_v9  ;;  %v3264_v11 = vsel %vm3110_vm5, %v3261_v60, %v3263_v37  ;;  %v2629_v46 = vmul.f32 %v6021_v38, %v5362_v22  ;;  %v2929_v7 = vadd.f32 %v2891_v35, %v2805_v56 }
 0x1d1   : > { %v3388_v15 = vsel %vm3110_vm5, %v3385_v28, %v3387_v34  ;;  %v2665_v41 = vmul.f32 %v5007_v25, %v5397_v36  ;;  %v2707_v49 = vmul.f32 %v4990_v13, %v5323_v63  ;;  %v2708_v60 = vmul.f32 %v4990_v13, %v6033_v57 }
 0x1d2   : > { %v3464_v58 = vmax.f32 %v3448_v31, 0.0  ;;  %v2645_v12 = vadd.f32 %v2629_v46, %v2593_v61  ;;  %v2832_v52 = vmul.f32 %v6022_v53, %v5362_v22  ;;  %v3053_v40 = vadd.f32 %v3015_v47, %v2929_v7 }
 0x1d3   : > { %v2768_v32 = vrot.slane %v2707_v49, 1  ;;  %v2833_v55 = vmul.f32 %v6022_v53, %v5372_v42  ;;  %v2956_v28 = vmul.f32 %v5010_v17, %v5397_v36  ;;  %v2769_v51 = vrot.slane %v2708_v60, 1 }
 0x1d4   : > { %4221 = vmatprep.mubr.f32.mxu0 %v3464_v58  ;;  %v2681_v10 = vadd.f32 %v2665_v41, %v2645_v12  ;;  %v2892_v18 = vrot.slane %v2832_v52, 1  ;;  %v2957_v24 = vmul.f32 %v5010_v17, %v5401_v27  ;;  %v3178_v48 = vadd.f32 %v3140_v3, %v3053_v40 }
 0x1d5   : > { %v2893_v14 = vrot.slane %v2833_v55, 1  ;;  %v3016_v1 = vrot.slane %v2956_v28, 1  ;;  %v3080_v29 = vmul.f32 %v4994_v16, %v5323_v63  ;;  %v2770_v0 = vsel %vm2737_vm4, %v2768_v32, %v2769_v51 }
 0x1d6   : > { %v3017_v43 = vrot.slane %v2957_v24, 1  ;;  %v3081_v30 = vmul.f32 %v4994_v16, %v6033_v57  ;;  %v3205_v44 = vmul.f32 %v4997_v20, %v5362_v22  ;;  %v3302_v33 = vadd.f32 %v3264_v11, %v3178_v48 }
 0x1d7   : > { %v2806_v9 = vadd.f32 %v2770_v0, %v2681_v10  ;;  %v2894_v45 = vsel %vm2737_vm4, %v2892_v18, %v2893_v14  ;;  %v3141_v35 = vrot.slane %v3080_v29, 2  ;;  %v3206_v63 = vmul.f32 %v4997_v20, %v5372_v42 }
 0x1d8   : > { %v3018_v37 = vsel %vm2737_vm4, %v3016_v1, %v3017_v43  ;;  %v3142_v56 = vrot.slane %v3081_v30, 2  ;;  %v3265_v47 = vrot.slane %v3205_v44, 2  ;;  %v3426_v3 = vadd.f32 %v3388_v15, %v3302_v33 }
 0x1d9   : > { %v2930_v34 = vadd.f32 %v2894_v45, %v2806_v9  ;;  %v3329_v31 = vmul.f32 %v5387_v6, %v5397_v36  ;;  %v3330_v61 = vmul.f32 %v5387_v6, %v5401_v27  ;;  %v3266_v46 = vrot.slane %v3206_v63, 2 }
 0x1da   : > { %v3143_v11 = vsel %vm3110_vm5, %v3141_v35, %v3142_v56  ;;  %v2594_v7 = vmul.f32 %v5003_v23, %v6033_v57  ;;  %v2630_v41 = vmul.f32 %v6021_v38, %v5372_v42  ;;  %v3449_v49 = vadd.f32 %v5464_v54, %v3426_v3 }
 0x1db   : > { %v3054_v58 = vadd.f32 %v3018_v37, %v2930_v34  ;;  %v3389_v15 = vrot.slane %v3329_v31, 2  ;;  %v3390_v12 = vrot.slane %v3330_v61, 2  ;;  %v3267_v60 = vsel %vm3110_vm5, %v3265_v47, %v3266_v46 }
 0x1dc   : > { %v2646_v52 = vadd.f32 %v2630_v41, %v2594_v7  ;;  %v2666_v40 = vmul.f32 %v5007_v25, %v5401_v27  ;;  %v2709_v32 = vmul.f32 %v4990_v13, %v6034_v62  ;;  %v3465_v55 = vmax.f32 %v3449_v49, 0.0 }
 0x1dd   : > { %v3179_v28 = vadd.f32 %v3143_v11, %v3054_v58  ;;  %v3391_v23 = vsel %vm3110_vm5, %v3389_v15, %v3390_v12  ;;  %v2834_v38 = vmul.f32 %v6022_v53, %v5330_v50  ;;  %v2958_v18 = vmul.f32 %v5010_v17, %v5368_v21 }
 0x1de   : > { %v2682_v57 = vadd.f32 %v2666_v40, %v2646_v52  ;;  %v2771_v10 = vrot.slane %v2709_v32, 1  ;;  %v3082_v24 = vmul.f32 %v4994_v16, %v6034_v62  ;;  %4222 = vmatmul.mubr.f32.gmra.mrb[28].mxu0 %v3465_v55  ;;  %v3207_v13 = vmul.f32 %v4997_v20, %v5330_v50  ;;  %v5882_v40 = vld [vmem:[%s5984_s8] ss:$0 sm:$0xff]  ;;  %v4411_v32 = vld [vmem:[%s4668_s23 + $0x8] sm:$0xff] }
 0x1df   : > { %v3303_v25 = vadd.f32 %v3267_v60, %v3179_v28  ;;  %v2895_v48 = vrot.slane %v2834_v38, 1  ;;  %v3331_v1 = vmul.f32 %v5387_v6, %v5368_v21  ;;  %v3019_v53 = vrot.slane %v2958_v18, 1  ;;  %v4412_v28 = vld [vmem:[%s4668_s23 + $0x10] sm:$0x3]  ;;  %v4413_v38 = vld [vmem:[%s4668_s23] sm:$0xff] }
 0x1e0   : > { %v2772_v29 = vsel %vm2737_vm4, %v2769_v51, %v2771_v10  ;;  %v3144_v0 = vrot.slane %v3082_v24, 2  ;;  %v3083_v30 = vmul.f32 %v4994_v16, %v5362_v22  ;;  %v3268_v33 = vrot.slane %v3207_v13, 2 }
 0x1e1   : > { %v3427_v17 = vadd.f32 %v3391_v23, %v3303_v25  ;;  %v2807_v44 = vadd.f32 %v2772_v29, %v2682_v57  ;;  %v2896_v62 = vsel %vm2737_vm4, %v2893_v14, %v2895_v48  ;;  %v3020_v9 = vsel %vm2737_vm4, %v3017_v43, %v3019_v53 }
 0x1e2   : > { %v3145_v45 = vsel %vm3110_vm5, %v3142_v56, %v3144_v0  ;;  %v3392_v35 = vrot.slane %v3331_v1, 2  ;;  %v3084_v6 = vmul.f32 %v4994_v16, %v5372_v42  ;;  %v3269_v63 = vsel %vm3110_vm5, %v3266_v46, %v3268_v33  ;;  %v4414_v0 = vld [vmem:[%s4668_s23 + $0x20] sm:$0xff] }
 0x1e3   : > { %v3450_v51 = vadd.f32 %v5464_v54, %v3427_v17  ;;  %v2931_v37 = vadd.f32 %v2896_v62, %v2807_v44  ;;  %v3146_v47 = vrot.slane %v3083_v30, 2  ;;  %v3208_v14 = vmul.f32 %v4997_v20, %v5397_v36  ;;  %v4415_v17 = vld [vmem:[%s4668_s23 + $0x28] sm:$0x3]  ;;  %v4416_v62 = vld [vmem:[%s4668_s23 + $0x18] sm:$0xff] }
 0x1e4   : > { %v3393_v22 = vsel %vm3110_vm5, %v3390_v12, %v3392_v35  ;;  %v3147_v3 = vrot.slane %v3084_v6, 2  ;;  %v3209_v43 = vmul.f32 %v4997_v20, %v5401_v27  ;;  %v3396_v42 = vsel %vm3110_vm5, %v3394_v8, %v3395_v5 }
 0x1e5   : > { %v3466_v56 = vmax.f32 %v3450_v51, 0.0  ;;  %v3055_v34 = vadd.f32 %v3020_v9, %v2931_v37  ;;  %v3085_v31 = vmul.f32 %v4994_v16, %v5330_v50  ;;  %v3270_v11 = vrot.slane %v3208_v14, 2  ;;  %v4417_v14 = vld [vmem:[%s4668_s23 + $0x38] sm:$0xff] }
 0x1e6   : > { %v3148_v61 = vsel %vm3110_vm5, %v3146_v47, %v3147_v3  ;;  %v3271_v46 = vrot.slane %v3209_v43, 2  ;;  %v3210_v36 = vmul.f32 %v4997_v20, %v5368_v21  ;;  %v3398_v39 = vsel %vm3110_vm5, %v3395_v5, %v3397_v59 }
 0x1e7   : > { %4224 = vmatprep.mubr.f32.mxu0 %v3466_v56  ;;  %v3180_v27 = vadd.f32 %v3145_v45, %v3055_v34  ;;  %v3181_v7 = vadd.f32 %v3148_v61, %v5451_v26  ;;  %v3149_v41 = vrot.slane %v3085_v31, 2  ;;  %v3655_v55 = vrot.slane %v4411_v32, 1  ;;  %v4418_v56 = vld [vmem:[%s4668_s23 + $0x40] sm:$0x3] }
 0x1e8   : > { %v3272_v16 = vsel %vm3110_vm5, %v3270_v11, %v3271_v46  ;;  %v3273_v50 = vrot.slane %v3210_v36, 2  ;;  %v3657_v23 = vrot.slane %v4412_v28, 1  ;;  %v3654_v57 = vrot.slane %v4413_v38, 1 }
 0x1e9   : > { %v3304_v8 = vadd.f32 %v3269_v63, %v3180_v27  ;;  %v3305_v49 = vadd.f32 %v3272_v16, %v3181_v7  ;;  %v3150_v58 = vsel %vm3110_vm5, %v3147_v3, %v3149_v41  ;;  %v3660_v30 = vrot.slane %v4414_v0, 1 }
 0x1ea   : > { %v3182_v20 = vadd.f32 %v3150_v58, %v5497_v4  ;;  %v3274_v21 = vsel %vm3110_vm5, %v3271_v46, %v3273_v50  ;;  %v3658_v24 = vsel %vm2737_vm4, %v3655_v55, %v3657_v23  ;;  %v3656_v13 = vsel %vm2737_vm4, %v3654_v57, %v3655_v55  ;;  %v4421_v58 = vld [vmem:[%s4668_s23 + $0x58] sm:$0x3]  ;;  %v4423_v55 = vld [vmem:[%s4668_s23 + $0x68] sm:$0xff]  ;;  %v4424_v23 = vld [vmem:[%s4668_s23 + $0x70] sm:$0x3] }
 0x1eb   : > { %v3428_v26 = vadd.f32 %v3393_v22, %v3304_v8  ;;  %v3429_v15 = vadd.f32 %v3396_v42, %v3305_v49  ;;  %v3662_v44 = vrot.slane %v4415_v17, 1  ;;  %v3659_v33 = vrot.slane %v4416_v62, 1  ;;  %v4419_v42 = vld [vmem:[%s4668_s23 + $0x30] sm:$0xff]  ;;  %v4425_v57 = vld [vmem:[%s4668_s23 + $0x60] sm:$0xff] }
 0x1ec   : > { %v3306_v2 = vadd.f32 %v3274_v21, %v3182_v20  ;;  %v3665_v43 = vrot.slane %v4417_v14, 1  ;;  %v3667_v34 = vrot.slane %v4418_v56, 1  ;;  %v3664_v31 = vrot.slane %v4419_v42, 1  ;;  %v4420_v8 = vld [vmem:[%s4668_s23 + $0x50] sm:$0xff]  ;;  %v4422_v21 = vld [vmem:[%s4668_s23 + $0x48] sm:$0xff] }
 0x1ed   : > { %v3451_v19 = vadd.f32 %v5464_v54, %v3428_v26  ;;  %v3452_v5 = vadd.f32 %v5464_v54, %v3429_v15  ;;  %v3663_v6 = vsel %vm2737_vm4, %v3660_v30, %v3662_v44  ;;  %v3661_v63 = vsel %vm2737_vm4, %v3659_v33, %v3660_v30  ;;  %v4426_v30 = vld [vmem:[%s4668_s23 + $0x80] sm:$0xff]  ;;  %v4427_v44 = vld [vmem:[%s4668_s23 + $0x88] sm:$0x3]  ;;  %v4428_v33 = vld [vmem:[%s4668_s23 + $0x78] sm:$0xff] }
 0x1ee   : > { %v3430_v59 = vadd.f32 %v3398_v39, %v3306_v2  ;;  %v3668_v36 = vsel %vm2737_vm4, %v3665_v43, %v3667_v34  ;;  %v3666_v41 = vsel %vm2737_vm4, %v3664_v31, %v3665_v43  ;;  %v3670_v49 = vrot.slane %v4420_v8, 1  ;;  %v4429_v43 = vld [vmem:[%s4668_s23 + $0x98] sm:$0xff]  ;;  %v4430_v34 = vld [vmem:[%s4668_s23 + $0xa0] sm:$0x3]  ;;  %v4431_v31 = vld [vmem:[%s4668_s23 + $0x90] sm:$0xff] }
 0x1ef   : > { %v3467_v12 = vmax.f32 %v3451_v19, 0.0  ;;  %v3468_v60 = vmax.f32 %v3452_v5, 0.0  ;;  %v3672_v20 = vrot.slane %v4421_v58, 1  ;;  %v3669_v26 = vrot.slane %v4422_v21, 1  ;;  %v4434_v58 = vld [vmem:[%s4668_s23 + $0xa8] sm:$0xff] }
 0x1f0   : > { %v3453_v52 = vadd.f32 %v5464_v54, %v3430_v59  ;;  %v3675_v28 = vrot.slane %v4423_v55, 1  ;;  %v3677_v38 = vrot.slane %v4424_v23, 1  ;;  %v3680_v17 = vrot.slane %v4426_v30, 1 }
 0x1f1   : > { %4225 = vmatmul.mubr.f32.gmra.mrb[30].mxu0 %v3467_v12  ;;  %v3673_v5 = vsel %vm2737_vm4, %v3670_v49, %v3672_v20  ;;  %v3682_v62 = vrot.slane %v4427_v44, 1  ;;  %v3685_v56 = vrot.slane %v4429_v43, 1  ;;  %v3687_v42 = vrot.slane %v4430_v34, 1 }
 0x1f2   : > { %4227 = vmatprep.mubr.f32.mxu0 %v3468_v60  ;;  %v3469_v4 = vmax.f32 %v3453_v52, 0.0  ;;  %v3671_v60 = vsel %vm2737_vm4, %v3669_v26, %v3670_v49  ;;  %v3689_v20 = vrot.slane %v4434_v58, 1 }
 0x1f5   : > { %4228 = vmatmul.mubr.f32.gmra.mrb[32].mxu0 %v3469_v4 }
 0x251   : > { %v4208_v54 = vpop.f32.mrb[18].mxu0 }
 0x252   : > { %v3565_v10 = vadd.f32 %v4208_v54, %v5882_v40  ;;  %v3559_v18 = vpop.f32.mrb[19].mxu0  ;;  %v3674_v54 = vrot.slane %v4425_v57, 1 }
 0x253   : > { %v3560_v25 = vadd.f32 %v5882_v40, %v3559_v18 }
 0x254   : > { %v3639_v48 = vmax.f32 %v3565_v10, 0.0 }
 0x255   : > { %v3638_v1 = vmax.f32 %v3560_v25, 0.0  ;;  %v3678_v25 = vsel %vm2737_vm4, %v3675_v28, %v3677_v38 }
 0x256   : > { %v3711_v29 = vadd.f32 %v3658_v24, %v3639_v48 }
 0x257   : > { %v3710_v53 = vadd.f32 %v3656_v13, %v3638_v1  ;;  %v3676_v1 = vsel %vm2737_vm4, %v3674_v54, %v3675_v28 }
 0x258   : > { %3727 = vst [vmem:[%s5894_s15 + $0x8] sm:$0xff] %v3711_v29 }
 0x259   : > { %3726 = vst [vmem:[%s5894_s15] sm:$0xff] %v3710_v53 }
 0x268   : > { %v4211_v9 = vpop.f32.mrb[20].mxu0 }
 0x269   : > { %v3575_v45 = vadd.f32 %v4211_v9, %v5882_v40  ;;  %v3569_v35 = vpop.f32.mrb[21].mxu0  ;;  %v3679_v9 = vrot.slane %v4428_v33, 1 }
 0x26a   : > { %v3570_v51 = vadd.f32 %v5882_v40, %v3569_v35 }
 0x26b   : > { %v3641_v37 = vmax.f32 %v3575_v45, 0.0 }
 0x26c   : > { %v3640_v47 = vmax.f32 %v3570_v51, 0.0  ;;  %v3683_v51 = vsel %vm2737_vm4, %v3680_v17, %v3682_v62 }
 0x26d   : > { %v3713_v22 = vadd.f32 %v3663_v6, %v3641_v37 }
 0x26e   : > { %v3712_v3 = vadd.f32 %v3661_v63, %v3640_v47  ;;  %v3681_v47 = vsel %vm2737_vm4, %v3679_v9, %v3680_v17 }
 0x26f   : > { %3729 = vst [vmem:[%s5894_s15 + $0x18] sm:$0xff] %v3713_v22 }
 0x270   : > { %3728 = vst [vmem:[%s5894_s15 + $0x10] sm:$0xff] %v3712_v3 }
 0x27a   : > { %v4214_v61 = vpop.f32.mrb[22].mxu0 }
 0x27b   : > { %v3585_v11 = vadd.f32 %v4214_v61, %v5882_v40  ;;  %v3579_v46 = vpop.f32.mrb[23].mxu0  ;;  %v3684_v61 = vrot.slane %v4431_v31, 1 }
 0x27c   : > { %v3580_v27 = vadd.f32 %v5882_v40, %v3579_v46 }
 0x27d   : > { %v3643_v7 = vmax.f32 %v3585_v11, 0.0  ;;  %v3686_v49 = vsel %vm2737_vm4, %v3684_v61, %v3685_v56 }
 0x27e   : > { %v3642_v39 = vmax.f32 %v3580_v27, 0.0  ;;  %v3688_v27 = vsel %vm2737_vm4, %v3685_v56, %v3687_v42 }
 0x27f   : > { %v3715_v16 = vadd.f32 %v3668_v36, %v3643_v7 }
 0x280   : > { %v3714_v50 = vadd.f32 %v3666_v41, %v3642_v39  ;;  %v4432_v41 = vld [vmem:[%s4668_s23 + $0xb0] sm:$0xff] }
 0x281   : > { %3731 = vst [vmem:[%s5894_s15 + $0x28] sm:$0xff] %v3715_v16  ;;  %v3690_v39 = vrot.slane %v4432_v41, 1  ;;  %v4433_v16 = vld [vmem:[%s4668_s23 + $0xb8] sm:$0x3] }
 0x282   : > { %3730 = vst [vmem:[%s5894_s15 + $0x20] sm:$0xff] %v3714_v50  ;;  %v3692_v50 = vrot.slane %v4433_v16, 1 }
 0x28c   : > { %v4217_v15 = vpop.f32.mrb[24].mxu0 }
 0x28d   : > { %v3595_v2 = vadd.f32 %v4217_v15, %v5882_v40  ;;  %v3589_v19 = vpop.f32.mrb[25].mxu0 }
 0x28e   : > { %v3590_v59 = vadd.f32 %v5882_v40, %v3589_v19 }
 0x28f   : > { %v3645_v12 = vmax.f32 %v3595_v2, 0.0 }
 0x290   : > { %v3644_v52 = vmax.f32 %v3590_v59, 0.0  ;;  %v3693_v59 = vsel %vm2737_vm4, %v3690_v39, %v3692_v50 }
 0x291   : > { %v3717_v4 = vadd.f32 %v3673_v5, %v3645_v12 }
 0x292   : > { %v3716_v32 = vadd.f32 %v3671_v60, %v3644_v52  ;;  %v3691_v52 = vsel %vm2737_vm4, %v3689_v20, %v3690_v39 }
 0x293   : > { %3733 = vst [vmem:[%s5894_s15 + $0x38] sm:$0xff] %v3717_v4 }
 0x294   : > { %3732 = vst [vmem:[%s5894_s15 + $0x30] sm:$0xff] %v3716_v32 }
 0x29f   : > { %v4220_v10 = vpop.f32.mrb[26].mxu0 }
 0x2a0   : > { %v3605_v18 = vadd.f32 %v4220_v10, %v5882_v40  ;;  %v3599_v24 = vpop.f32.mrb[27].mxu0 }
 0x2a1   : > { %v3600_v48 = vadd.f32 %v5882_v40, %v3599_v24 }
 0x2a2   : > { %v3647_v13 = vmax.f32 %v3605_v18, 0.0 }
 0x2a3   : > { %v3646_v29 = vmax.f32 %v3600_v48, 0.0 }
 0x2a4   : > { %v3719_v53 = vadd.f32 %v3678_v25, %v3647_v13 }
 0x2a5   : > { %v3718_v0 = vadd.f32 %v3676_v1, %v3646_v29 }
 0x2a6   : > { %3735 = vst [vmem:[%s5894_s15 + $0x48] sm:$0xff] %v3719_v53 }
 0x2a7   : > { %3734 = vst [vmem:[%s5894_s15 + $0x40] sm:$0xff] %v3718_v0 }
 0x2b1   : > { %v4223_v45 = vpop.f32.mrb[28].mxu0 }
 0x2b2   : > { %v3615_v35 = vadd.f32 %v4223_v45, %v5882_v40  ;;  %v3609_v6 = vpop.f32.mrb[29].mxu0 }
 0x2b3   : > { %v3610_v37 = vadd.f32 %v5882_v40, %v3609_v6 }
 0x2b4   : > { %v3649_v63 = vmax.f32 %v3615_v35, 0.0 }
 0x2b5   : > { %v3648_v22 = vmax.f32 %v3610_v37, 0.0 }
 0x2b6   : > { %v3721_v3 = vadd.f32 %v3683_v51, %v3649_v63 }
 0x2b7   : > { %v3720_v14 = vadd.f32 %v3681_v47, %v3648_v22 }
 0x2b8   : > { %3737 = vst [vmem:[%s5894_s15 + $0x58] sm:$0xff] %v3721_v3 }
 0x2b9   : > { %3736 = vst [vmem:[%s5894_s15 + $0x50] sm:$0xff] %v3720_v14 }
 0x2c4   : > { %v4226_v11 = vpop.f32.mrb[30].mxu0 }
 0x2c5   : > { %v3625_v46 = vadd.f32 %v4226_v11, %v5882_v40  ;;  %v3619_v36 = vpop.f32.mrb[31].mxu0 }
 0x2c6   : > { %v3620_v7 = vadd.f32 %v5882_v40, %v3619_v36 }
 0x2c7   : > { %v3651_v8 = vmax.f32 %v3625_v46, 0.0 }
 0x2c8   : > { %v3650_v21 = vmax.f32 %v3620_v7, 0.0  ;;  %v4229_v26 = vpop.f32.mrb[32].mxu0 }
 0x2c9   : > { %v3723_v15 = vadd.f32 %v3688_v27, %v3651_v8  ;;  %v3635_v2 = vadd.f32 %v4229_v26, %v5882_v40  ;;  %v3629_v19 = vpop.f32.mrb[33].mxu0 }
 0x2ca   : > { %v3722_v5 = vadd.f32 %v3686_v49, %v3650_v21  ;;  %v3630_v12 = vadd.f32 %v5882_v40, %v3629_v19 }
 0x2cb   : > { %3739 = vst [vmem:[%s5894_s15 + $0x68] sm:$0xff] %v3723_v15  ;;  %v3653_v60 = vmax.f32 %v3635_v2, 0.0 }
 0x2cc   : > { %3738 = vst [vmem:[%s5894_s15 + $0x60] sm:$0xff] %v3722_v5  ;;  %v3652_v4 = vmax.f32 %v3630_v12, 0.0 }
 0x2cd   : > { %v3725_v32 = vadd.f32 %v3693_v59, %v3653_v60 }
 0x2ce   : > { %v3724_v55 = vadd.f32 %v3691_v52, %v3652_v4 }
 0x2cf   : > { %3741 = vst [vmem:[%s5894_s15 + $0x78] sm:$0xff] %v3725_v32 }
 0x2d0   : > { %3740 = vst [vmem:[%s5894_s15 + $0x70] sm:$0xff] %v3724_v55 }
 0x2d1 PF: > { %s19_s13 = sadd.s32 1, %s4481_s13   ;;  %s6035_s23 = sld [smem:[#allocation2_spill]] }
 0x2d2   : > { %p16_p12 = scmp.ge.s32.totalorder %s19_s13, 6   ;;  %s6036_s30 = smov %s4473_s11 }
 0x2d3   : > { %s6037_s10 = smov %s4477_s12  ;;  %s6038_s11 = smov %s6041_s14 }
 0x2d4   :  { %18 = sbr.rel (!%p16_p12) target bundleno = 3 (0x3), region = 92 }
 0x2d7   : > { %s6039_s12 = smov %s6035_s23 }

</bundles_post_ra>
